<compile_context>
chip_gen: v5e
topology: v5e:2x2
jax: 0.10.0
libtpu: 0.0.40
codegen_flags: <defaults>
</compile_context>

<pallas_src>
import functools

import jax
import jax.numpy as jnp
from jax.experimental import pallas as pl
from jax.experimental.pallas import tpu as pltpu  # noqa: F401  (kept for scratch/CompilerParams if scaled up)


# -----------------------------------------------------------------------------
# Fused Pallas kernel: all LSTM layers (wavefront-interleaved) + FC head.
# -----------------------------------------------------------------------------
def _fused_lstm_fc_kernel(*refs, num_layers, hidden_size, seq_len, batch):
    """refs layout:
        refs[0]                    : x      (T*B, D_in) f32, time-major flattened
        refs[1+3l : 4+3l]          : (w_ih_l (D_l,4H) bf16, w_hh_l (H,4H) bf16, b_l (1,4H) f32)
        refs[1+3L], refs[2+3L]     : fc_w (H, O) bf16, fc_b (1, O) f32
        refs[3+3L]                 : out_ref (B, O) f32
    """
    H, T, B, L = hidden_size, seq_len, batch, num_layers
    x_ref = refs[0]
    fcw_ref = refs[1 + 3 * L]
    fcb_ref = refs[2 + 3 * L]
    out_ref = refs[3 + 3 * L]

    # Hoist every weight load once, outside the unrolled loops.
    wih = [refs[1 + 3 * l][...] for l in range(L)]     # bf16 (D_l, 4H)
    whh = [refs[2 + 3 * l][...] for l in range(L)]     # bf16 (H, 4H)
    bias = [refs[3 + 3 * l][...] for l in range(L)]    # f32  (1, 4H), b_ih + b_hh fused

    # Layer 0: hoisted, time-parallel input projection (+ fused bias): one MXU matmul.
    xg0 = (jnp.dot(x_ref[...].astype(jnp.bfloat16), wih[0],
                   preferred_element_type=jnp.float32)
           + bias[0])                                   # (T*B, 4H) f32

    def cell(g, c_prev):
        # PyTorch gate order: i, f, g, o.  All elementwise math stays f32.
        i = jax.nn.sigmoid(g[:, 0 * H:1 * H])
        f = jax.nn.sigmoid(g[:, 1 * H:2 * H])
        gg = jnp.tanh(g[:, 2 * H:3 * H])
        o = jax.nn.sigmoid(g[:, 3 * H:4 * H])
        c_new = f * c_prev + i * gg
        return o * jnp.tanh(c_new), c_new

    h = [jnp.zeros((B, H), jnp.float32) for _ in range(L)]
    c = [jnp.zeros((B, H), jnp.float32) for _ in range(L)]

    # Wavefront schedule: step s runs layer l at timestep t = s - l (if valid).
    # Layer l at time t reads layer l-1's h_t, which was produced at step s-1,
    # so every update inside a single wavefront step is independent of the
    # others -> the scheduler can overlap the per-layer MXU/EUP chains.
    for s in range(T + L - 1):
        h_new, c_new = list(h), list(c)
        for l in range(L):
            t = s - l
            if t < 0 or t >= T:
                continue
            if l == 0:
                g = xg0[t * B:(t + 1) * B, :] + jnp.dot(
                    h[0].astype(jnp.bfloat16), whh[0],
                    preferred_element_type=jnp.float32)
            else:
                g = (jnp.dot(h[l - 1].astype(jnp.bfloat16), wih[l],
                             preferred_element_type=jnp.float32)
                     + jnp.dot(h[l].astype(jnp.bfloat16), whh[l],
                               preferred_element_type=jnp.float32)
                     + bias[l])
            h_new[l], c_new[l] = cell(g, c[l])
        h, c = h_new, c_new

    # FC head on the last hidden state of the last layer (== out[:, -1, :]).
    out_ref[...] = (jnp.dot(h[L - 1].astype(jnp.bfloat16), fcw_ref[...],
                            preferred_element_type=jnp.float32)
                    + fcb_ref[...]).astype(out_ref.dtype)


# -----------------------------------------------------------------------------
# Wrappers
# -----------------------------------------------------------------------------
def prepare_params(params):
    """One-time layout plumbing: transpose weights, fuse biases, cast MXU
    operands to bf16 (f32 accumulation is kept inside the kernel)."""
    prep = {"lstm": []}
    for (w_ih, w_hh, b_ih, b_hh) in params["lstm"]:
        h4 = w_ih.shape[0]
        prep["lstm"].append((
            jnp.transpose(w_ih).astype(jnp.bfloat16),              # (D_in, 4H)
            jnp.transpose(w_hh).astype(jnp.bfloat16),              # (H, 4H)
            (b_ih + b_hh).reshape(1, h4).astype(jnp.float32),      # (1, 4H)
        ))
    out_size = params["fc_w"].shape[0]
    prep["fc_w"] = jnp.transpose(params["fc_w"]).astype(jnp.bfloat16)   # (H, O)
    prep["fc_b"] = params["fc_b"].reshape(1, out_size).astype(jnp.float32)
    return prep


def lstm_model_forward(x, prep, hidden_size, num_layers):
    """Full forward pass, matching LSTMModel.forward.

    x: (B, T, input_size) batch-first (PyTorch convention) -> (B, output_size).
    """
    B, T, D_in = x.shape
    H = hidden_size
    O = prep["fc_w"].shape[1]

    # time-major + flatten (T, B, D) -> (T*B, D) so the kernel only does 2-D matmuls
    x_flat = jnp.transpose(x, (1, 0, 2)).reshape(T * B, D_in).astype(jnp.float32)

    operands = [x_flat]
    in_specs = [pl.BlockSpec((T * B, D_in), lambda: (0, 0))]
    for (wih, whh, b) in prep["lstm"]:
        operands += [wih, whh, b]
        in_specs += [
            pl.BlockSpec(wih.shape, lambda: (0, 0)),
            pl.BlockSpec(whh.shape, lambda: (0, 0)),
            pl.BlockSpec(b.shape, lambda: (0, 0)),
        ]
    operands += [prep["fc_w"], prep["fc_b"]]
    in_specs += [pl.BlockSpec((H, O), lambda: (0, 0)),
                 pl.BlockSpec((1, O), lambda: (0, 0))]

    kernel = functools.partial(_fused_lstm_fc_kernel,
                               num_layers=num_layers, hidden_size=H,
                               seq_len=T, batch=B)

    # NOTE: the whole live set (x, xg0, weights, states) is < 1 MiB here; if
    # scaled up (large H/T/B), re-budget against v7x's 64 MiB VMEM and add a
    # T-chunk grid / vmem_limit_bytes.
    return pl.pallas_call(
        kernel,
        out_shape=jax.ShapeDtypeStruct((B, O), jnp.float32),
        in_specs=in_specs,
        out_specs=pl.BlockSpec((B, O), lambda: (0, 0)),
    )(*operands)


# -----------------------------------------------------------------------------
# Pure-JAX reference (for correctness check; f32 throughout)
# -----------------------------------------------------------------------------
def lstm_model_reference(x, params, hidden_size, num_layers):
    B = x.shape[0]
    seq = jnp.transpose(x, (1, 0, 2)).astype(jnp.float32)  # (T, B, D)
    H = hidden_size
    for l in range(num_layers):
        w_ih, w_hh, b_ih, b_hh = params["lstm"][l]

        def step(carry, x_t):
            h, c = carry
            gates = x_t @ w_ih.T + h @ w_hh.T + b_ih + b_hh
            i = jax.nn.sigmoid(gates[:, 0 * H:1 * H])
            f = jax.nn.sigmoid(gates[:, 1 * H:2 * H])
            g = jnp.tanh(gates[:, 2 * H:3 * H])
            o = jax.nn.sigmoid(gates[:, 3 * H:4 * H])
            c = f * c + i * g
            h = o * jnp.tanh(c)
            return (h, c), h

        h0 = jnp.zeros((B, H), jnp.float32)
        c0 = jnp.zeros((B, H), jnp.float32)
        _, seq = jax.lax.scan(step, (h0, c0), seq)
    return seq[-1] @ params["fc_w"].T + params["fc_b"]


# -----------------------------------------------------------------------------
# Deterministic parameter init (PyTorch-style uniform(-1/sqrt(H), 1/sqrt(H)))
# -----------------------------------------------------------------------------
def init_params(key, input_size, hidden_size, num_layers, output_size):
    H = hidden_size
    scale = 1.0 / jnp.sqrt(jnp.float32(H))
    params = {"lstm": []}
    for l in range(num_layers):
        d_in = input_size if l == 0 else H
        key, k1, k2, k3, k4 = jax.random.split(key, 5)
        params["lstm"].append((
            jax.random.uniform(k1, (4 * H, d_in), jnp.float32, -scale, scale),
            jax.random.uniform(k2, (4 * H, H), jnp.float32, -scale, scale),
            jax.random.uniform(k3, (4 * H,), jnp.float32, -scale, scale),
            jax.random.uniform(k4, (4 * H,), jnp.float32, -scale, scale),
        ))
    key, k5, k6 = jax.random.split(key, 3)
    params["fc_w"] = jax.random.uniform(k5, (output_size, H), jnp.float32,
                                        -scale, scale)
    params["fc_b"] = jax.random.uniform(k6, (output_size,), jnp.float32,
                                        -scale, scale)
    return params


# -----------------------------------------------------------------------------
if __name__ == "__main__":
    INPUT_SIZE = 16
    HIDDEN_SIZE = 32
    NUM_LAYERS = 2
    OUTPUT_SIZE = 4
    BATCH = 2
    SEQ = 8

    key = jax.random.PRNGKey(0)
    key, pkey, xkey = jax.random.split(key, 3)
    params = init_params(pkey, INPUT_SIZE, HIDDEN_SIZE, NUM_LAYERS, OUTPUT_SIZE)
    x = jax.random.normal(xkey, (BATCH, SEQ, INPUT_SIZE), jnp.float32)

    # One-time parameter preparation (off the inference path).
    prep = jax.tree_util.tree_map(jax.block_until_ready, prepare_params(params))

    fwd = jax.jit(functools.partial(lstm_model_forward,
                                    hidden_size=HIDDEN_SIZE,
                                    num_layers=NUM_LAYERS))
    out = jax.block_until_ready(fwd(x, prep))

    ref = jax.block_until_ready(
        lstm_model_reference(x, params, HIDDEN_SIZE, NUM_LAYERS))

    assert out.shape == (BATCH, OUTPUT_SIZE), out.shape
    # bf16 MXU operands (f32 accumulation) -> relaxed tolerance vs f32 reference.
    assert jnp.allclose(out, ref, atol=2e-2, rtol=2e-2), (
        f"max abs err = {jnp.max(jnp.abs(out - ref))}")

    print("KERNEL_OK")
</pallas_src>

<mosaic_0001>
module attributes {stable_mosaic.version = 11 : i64} {
  func.func @_fused_lstm_fc_kernel(%arg0: memref<16x16xf32, #tpu.memory_space<vmem>>, %arg1: memref<16x128xbf16, #tpu.memory_space<vmem>>, %arg2: memref<32x128xbf16, #tpu.memory_space<vmem>>, %arg3: memref<1x128xf32, #tpu.memory_space<vmem>>, %arg4: memref<32x128xbf16, #tpu.memory_space<vmem>>, %arg5: memref<32x128xbf16, #tpu.memory_space<vmem>>, %arg6: memref<1x128xf32, #tpu.memory_space<vmem>>, %arg7: memref<32x4xbf16, #tpu.memory_space<vmem>>, %arg8: memref<1x4xf32, #tpu.memory_space<vmem>>, %arg9: memref<2x4xf32, #tpu.memory_space<vmem>>) attributes {dimension_semantics = [], scalar_prefetch = 0 : i64, scratch_operands = 0 : i64, tpu.core_type = #tpu.core_type<tc>} {
    %c0 = arith.constant 0 : index
    %c0_0 = arith.constant 0 : index
    %0 = vector.load %arg1[%c0, %c0_0] : memref<16x128xbf16, #tpu.memory_space<vmem>>, vector<16x128xbf16>
    %c0_1 = arith.constant 0 : index
    %c0_2 = arith.constant 0 : index
    %1 = vector.load %arg4[%c0_1, %c0_2] : memref<32x128xbf16, #tpu.memory_space<vmem>>, vector<32x128xbf16>
    %c0_3 = arith.constant 0 : index
    %c0_4 = arith.constant 0 : index
    %2 = vector.load %arg2[%c0_3, %c0_4] : memref<32x128xbf16, #tpu.memory_space<vmem>>, vector<32x128xbf16>
    %c0_5 = arith.constant 0 : index
    %c0_6 = arith.constant 0 : index
    %3 = vector.load %arg5[%c0_5, %c0_6] : memref<32x128xbf16, #tpu.memory_space<vmem>>, vector<32x128xbf16>
    %c0_7 = arith.constant 0 : index
    %c0_8 = arith.constant 0 : index
    %4 = vector.load %arg3[%c0_7, %c0_8] : memref<1x128xf32, #tpu.memory_space<vmem>>, vector<1x128xf32>
    %c0_9 = arith.constant 0 : index
    %c0_10 = arith.constant 0 : index
    %5 = vector.load %arg6[%c0_9, %c0_10] : memref<1x128xf32, #tpu.memory_space<vmem>>, vector<1x128xf32>
    %c0_11 = arith.constant 0 : index
    %c0_12 = arith.constant 0 : index
    %6 = vector.load %arg0[%c0_11, %c0_12] : memref<16x16xf32, #tpu.memory_space<vmem>>, vector<16x16xf32>
    %7 = arith.truncf %6 : vector<16x16xf32> to vector<16x16xbf16>
    %cst = arith.constant dense<0.000000e+00> : vector<16x128xf32>
    %8 = tpu.matmul %7, %0, %cst {dimension_numbers = #tpu.dot_dimension_numbers<[1], [0], [0], [1], [0, 0, 1, 1], [], []>} : vector<16x16xbf16>, vector<16x128xbf16>, vector<16x128xf32> -> vector<16x128xf32>
    %9 = vector.broadcast %4 : vector<1x128xf32> to vector<16x128xf32>
    %10 = arith.addf %8, %9 : vector<16x128xf32>
    %cst_13 = arith.constant 0.000000e+00 : f32
    %11 = vector.broadcast %cst_13 : f32 to vector<2x32xf32>
    %cst_14 = arith.constant 0.000000e+00 : f32
    %12 = vector.broadcast %cst_14 : f32 to vector<2x32xf32>
    %cst_15 = arith.constant 0.000000e+00 : f32
    %13 = vector.broadcast %cst_15 : f32 to vector<2x32xf32>
    %cst_16 = arith.constant 0.000000e+00 : f32
    %14 = vector.broadcast %cst_16 : f32 to vector<2x32xf32>
    %15 = vector.extract_strided_slice %10 {offsets = [0, 0], sizes = [2, 128], strides = [1, 1]} : vector<16x128xf32> to vector<2x128xf32>
    %16 = arith.truncf %11 : vector<2x32xf32> to vector<2x32xbf16>
    %cst_17 = arith.constant dense<0.000000e+00> : vector<2x128xf32>
    %17 = tpu.matmul %16, %2, %cst_17 {dimension_numbers = #tpu.dot_dimension_numbers<[1], [0], [0], [1], [0, 0, 1, 1], [], []>} : vector<2x32xbf16>, vector<32x128xbf16>, vector<2x128xf32> -> vector<2x128xf32>
    %18 = arith.addf %15, %17 : vector<2x128xf32>
    %19 = vector.extract_strided_slice %18 {offsets = [0, 0], sizes = [2, 32], strides = [1, 1]} : vector<2x128xf32> to vector<2x32xf32>
    %20 = arith.negf %19 : vector<2x32xf32>
    %21 = math.exp %20 : vector<2x32xf32>
    %cst_18 = arith.constant 1.000000e+00 : f32
    %22 = vector.broadcast %cst_18 : f32 to vector<2x32xf32>
    %23 = arith.addf %22, %21 : vector<2x32xf32>
    %24 = arith.divf %22, %23 : vector<2x32xf32>
    %25 = vector.extract_strided_slice %18 {offsets = [0, 32], sizes = [2, 32], strides = [1, 1]} : vector<2x128xf32> to vector<2x32xf32>
    %26 = arith.negf %25 : vector<2x32xf32>
    %27 = math.exp %26 : vector<2x32xf32>
    %cst_19 = arith.constant 1.000000e+00 : f32
    %28 = vector.broadcast %cst_19 : f32 to vector<2x32xf32>
    %29 = arith.addf %28, %27 : vector<2x32xf32>
    %30 = arith.divf %28, %29 : vector<2x32xf32>
    %31 = vector.extract_strided_slice %18 {offsets = [0, 64], sizes = [2, 32], strides = [1, 1]} : vector<2x128xf32> to vector<2x32xf32>
    %32 = math.tanh %31 : vector<2x32xf32>
    %33 = vector.extract_strided_slice %18 {offsets = [0, 96], sizes = [2, 32], strides = [1, 1]} : vector<2x128xf32> to vector<2x32xf32>
    %34 = arith.negf %33 : vector<2x32xf32>
    %35 = math.exp %34 : vector<2x32xf32>
    %cst_20 = arith.constant 1.000000e+00 : f32
    %36 = vector.broadcast %cst_20 : f32 to vector<2x32xf32>
    %37 = arith.addf %36, %35 : vector<2x32xf32>
    %38 = arith.divf %36, %37 : vector<2x32xf32>
    %39 = arith.mulf %30, %13 : vector<2x32xf32>
    %40 = arith.mulf %24, %32 : vector<2x32xf32>
    %41 = arith.addf %39, %40 : vector<2x32xf32>
    %42 = math.tanh %41 : vector<2x32xf32>
    %43 = arith.mulf %38, %42 : vector<2x32xf32>
    %44 = vector.extract_strided_slice %10 {offsets = [2, 0], sizes = [2, 128], strides = [1, 1]} : vector<16x128xf32> to vector<2x128xf32>
    %45 = arith.truncf %43 : vector<2x32xf32> to vector<2x32xbf16>
    %cst_21 = arith.constant dense<0.000000e+00> : vector<2x128xf32>
    %46 = tpu.matmul %45, %2, %cst_21 {dimension_numbers = #tpu.dot_dimension_numbers<[1], [0], [0], [1], [0, 0, 1, 1], [], []>} : vector<2x32xbf16>, vector<32x128xbf16>, vector<2x128xf32> -> vector<2x128xf32>
    %47 = arith.addf %44, %46 : vector<2x128xf32>
    %48 = vector.extract_strided_slice %47 {offsets = [0, 0], sizes = [2, 32], strides = [1, 1]} : vector<2x128xf32> to vector<2x32xf32>
    %49 = arith.negf %48 : vector<2x32xf32>
    %50 = math.exp %49 : vector<2x32xf32>
    %cst_22 = arith.constant 1.000000e+00 : f32
    %51 = vector.broadcast %cst_22 : f32 to vector<2x32xf32>
    %52 = arith.addf %51, %50 : vector<2x32xf32>
    %53 = arith.divf %51, %52 : vector<2x32xf32>
    %54 = vector.extract_strided_slice %47 {offsets = [0, 32], sizes = [2, 32], strides = [1, 1]} : vector<2x128xf32> to vector<2x32xf32>
    %55 = arith.negf %54 : vector<2x32xf32>
    %56 = math.exp %55 : vector<2x32xf32>
    %cst_23 = arith.constant 1.000000e+00 : f32
    %57 = vector.broadcast %cst_23 : f32 to vector<2x32xf32>
    %58 = arith.addf %57, %56 : vector<2x32xf32>
    %59 = arith.divf %57, %58 : vector<2x32xf32>
    %60 = vector.extract_strided_slice %47 {offsets = [0, 64], sizes = [2, 32], strides = [1, 1]} : vector<2x128xf32> to vector<2x32xf32>
    %61 = math.tanh %60 : vector<2x32xf32>
    %62 = vector.extract_strided_slice %47 {offsets = [0, 96], sizes = [2, 32], strides = [1, 1]} : vector<2x128xf32> to vector<2x32xf32>
    %63 = arith.negf %62 : vector<2x32xf32>
    %64 = math.exp %63 : vector<2x32xf32>
    %cst_24 = arith.constant 1.000000e+00 : f32
    %65 = vector.broadcast %cst_24 : f32 to vector<2x32xf32>
    %66 = arith.addf %65, %64 : vector<2x32xf32>
    %67 = arith.divf %65, %66 : vector<2x32xf32>
    %68 = arith.mulf %59, %41 : vector<2x32xf32>
    %69 = arith.mulf %53, %61 : vector<2x32xf32>
    %70 = arith.addf %68, %69 : vector<2x32xf32>
    %71 = math.tanh %70 : vector<2x32xf32>
    %72 = arith.mulf %67, %71 : vector<2x32xf32>
    %73 = arith.truncf %43 : vector<2x32xf32> to vector<2x32xbf16>
    %cst_25 = arith.constant dense<0.000000e+00> : vector<2x128xf32>
    %74 = tpu.matmul %73, %1, %cst_25 {dimension_numbers = #tpu.dot_dimension_numbers<[1], [0], [0], [1], [0, 0, 1, 1], [], []>} : vector<2x32xbf16>, vector<32x128xbf16>, vector<2x128xf32> -> vector<2x128xf32>
    %75 = arith.truncf %12 : vector<2x32xf32> to vector<2x32xbf16>
    %cst_26 = arith.constant dense<0.000000e+00> : vector<2x128xf32>
    %76 = tpu.matmul %75, %3, %cst_26 {dimension_numbers = #tpu.dot_dimension_numbers<[1], [0], [0], [1], [0, 0, 1, 1], [], []>} : vector<2x32xbf16>, vector<32x128xbf16>, vector<2x128xf32> -> vector<2x128xf32>
    %77 = arith.addf %74, %76 : vector<2x128xf32>
    %78 = vector.broadcast %5 : vector<1x128xf32> to vector<2x128xf32>
    %79 = arith.addf %77, %78 : vector<2x128xf32>
    %80 = vector.extract_strided_slice %79 {offsets = [0, 0], sizes = [2, 32], strides = [1, 1]} : vector<2x128xf32> to vector<2x32xf32>
    %81 = arith.negf %80 : vector<2x32xf32>
    %82 = math.exp %81 : vector<2x32xf32>
    %cst_27 = arith.constant 1.000000e+00 : f32
    %83 = vector.broadcast %cst_27 : f32 to vector<2x32xf32>
    %84 = arith.addf %83, %82 : vector<2x32xf32>
    %85 = arith.divf %83, %84 : vector<2x32xf32>
    %86 = vector.extract_strided_slice %79 {offsets = [0, 32], sizes = [2, 32], strides = [1, 1]} : vector<2x128xf32> to vector<2x32xf32>
    %87 = arith.negf %86 : vector<2x32xf32>
    %88 = math.exp %87 : vector<2x32xf32>
    %cst_28 = arith.constant 1.000000e+00 : f32
    %89 = vector.broadcast %cst_28 : f32 to vector<2x32xf32>
    %90 = arith.addf %89, %88 : vector<2x32xf32>
    %91 = arith.divf %89, %90 : vector<2x32xf32>
    %92 = vector.extract_strided_slice %79 {offsets = [0, 64], sizes = [2, 32], strides = [1, 1]} : vector<2x128xf32> to vector<2x32xf32>
    %93 = math.tanh %92 : vector<2x32xf32>
    %94 = vector.extract_strided_slice %79 {offsets = [0, 96], sizes = [2, 32], strides = [1, 1]} : vector<2x128xf32> to vector<2x32xf32>
    %95 = arith.negf %94 : vector<2x32xf32>
    %96 = math.exp %95 : vector<2x32xf32>
    %cst_29 = arith.constant 1.000000e+00 : f32
    %97 = vector.broadcast %cst_29 : f32 to vector<2x32xf32>
    %98 = arith.addf %97, %96 : vector<2x32xf32>
    %99 = arith.divf %97, %98 : vector<2x32xf32>
    %100 = arith.mulf %91, %14 : vector<2x32xf32>
    %101 = arith.mulf %85, %93 : vector<2x32xf32>
    %102 = arith.addf %100, %101 : vector<2x32xf32>
    %103 = math.tanh %102 : vector<2x32xf32>
    %104 = arith.mulf %99, %103 : vector<2x32xf32>
    %105 = vector.extract_strided_slice %10 {offsets = [4, 0], sizes = [2, 128], strides = [1, 1]} : vector<16x128xf32> to vector<2x128xf32>
    %106 = arith.truncf %72 : vector<2x32xf32> to vector<2x32xbf16>
    %cst_30 = arith.constant dense<0.000000e+00> : vector<2x128xf32>
    %107 = tpu.matmul %106, %2, %cst_30 {dimension_numbers = #tpu.dot_dimension_numbers<[1], [0], [0], [1], [0, 0, 1, 1], [], []>} : vector<2x32xbf16>, vector<32x128xbf16>, vector<2x128xf32> -> vector<2x128xf32>
    %108 = arith.addf %105, %107 : vector<2x128xf32>
    %109 = vector.extract_strided_slice %108 {offsets = [0, 0], sizes = [2, 32], strides = [1, 1]} : vector<2x128xf32> to vector<2x32xf32>
    %110 = arith.negf %109 : vector<2x32xf32>
    %111 = math.exp %110 : vector<2x32xf32>
    %cst_31 = arith.constant 1.000000e+00 : f32
    %112 = vector.broadcast %cst_31 : f32 to vector<2x32xf32>
    %113 = arith.addf %112, %111 : vector<2x32xf32>
    %114 = arith.divf %112, %113 : vector<2x32xf32>
    %115 = vector.extract_strided_slice %108 {offsets = [0, 32], sizes = [2, 32], strides = [1, 1]} : vector<2x128xf32> to vector<2x32xf32>
    %116 = arith.negf %115 : vector<2x32xf32>
    %117 = math.exp %116 : vector<2x32xf32>
    %cst_32 = arith.constant 1.000000e+00 : f32
    %118 = vector.broadcast %cst_32 : f32 to vector<2x32xf32>
    %119 = arith.addf %118, %117 : vector<2x32xf32>
    %120 = arith.divf %118, %119 : vector<2x32xf32>
    %121 = vector.extract_strided_slice %108 {offsets = [0, 64], sizes = [2, 32], strides = [1, 1]} : vector<2x128xf32> to vector<2x32xf32>
    %122 = math.tanh %121 : vector<2x32xf32>
    %123 = vector.extract_strided_slice %108 {offsets = [0, 96], sizes = [2, 32], strides = [1, 1]} : vector<2x128xf32> to vector<2x32xf32>
    %124 = arith.negf %123 : vector<2x32xf32>
    %125 = math.exp %124 : vector<2x32xf32>
    %cst_33 = arith.constant 1.000000e+00 : f32
    %126 = vector.broadcast %cst_33 : f32 to vector<2x32xf32>
    %127 = arith.addf %126, %125 : vector<2x32xf32>
    %128 = arith.divf %126, %127 : vector<2x32xf32>
    %129 = arith.mulf %120, %70 : vector<2x32xf32>
    %130 = arith.mulf %114, %122 : vector<2x32xf32>
    %131 = arith.addf %129, %130 : vector<2x32xf32>
    %132 = math.tanh %131 : vector<2x32xf32>
    %133 = arith.mulf %128, %132 : vector<2x32xf32>
    %134 = arith.truncf %72 : vector<2x32xf32> to vector<2x32xbf16>
    %cst_34 = arith.constant dense<0.000000e+00> : vector<2x128xf32>
    %135 = tpu.matmul %134, %1, %cst_34 {dimension_numbers = #tpu.dot_dimension_numbers<[1], [0], [0], [1], [0, 0, 1, 1], [], []>} : vector<2x32xbf16>, vector<32x128xbf16>, vector<2x128xf32> -> vector<2x128xf32>
    %136 = arith.truncf %104 : vector<2x32xf32> to vector<2x32xbf16>
    %cst_35 = arith.constant dense<0.000000e+00> : vector<2x128xf32>
    %137 = tpu.matmul %136, %3, %cst_35 {dimension_numbers = #tpu.dot_dimension_numbers<[1], [0], [0], [1], [0, 0, 1, 1], [], []>} : vector<2x32xbf16>, vector<32x128xbf16>, vector<2x128xf32> -> vector<2x128xf32>
    %138 = arith.addf %135, %137 : vector<2x128xf32>
    %139 = vector.broadcast %5 : vector<1x128xf32> to vector<2x128xf32>
    %140 = arith.addf %138, %139 : vector<2x128xf32>
    %141 = vector.extract_strided_slice %140 {offsets = [0, 0], sizes = [2, 32], strides = [1, 1]} : vector<2x128xf32> to vector<2x32xf32>
    %142 = arith.negf %141 : vector<2x32xf32>
    %143 = math.exp %142 : vector<2x32xf32>
    %cst_36 = arith.constant 1.000000e+00 : f32
    %144 = vector.broadcast %cst_36 : f32 to vector<2x32xf32>
    %145 = arith.addf %144, %143 : vector<2x32xf32>
    %146 = arith.divf %144, %145 : vector<2x32xf32>
    %147 = vector.extract_strided_slice %140 {offsets = [0, 32], sizes = [2, 32], strides = [1, 1]} : vector<2x128xf32> to vector<2x32xf32>
    %148 = arith.negf %147 : vector<2x32xf32>
    %149 = math.exp %148 : vector<2x32xf32>
    %cst_37 = arith.constant 1.000000e+00 : f32
    %150 = vector.broadcast %cst_37 : f32 to vector<2x32xf32>
    %151 = arith.addf %150, %149 : vector<2x32xf32>
    %152 = arith.divf %150, %151 : vector<2x32xf32>
    %153 = vector.extract_strided_slice %140 {offsets = [0, 64], sizes = [2, 32], strides = [1, 1]} : vector<2x128xf32> to vector<2x32xf32>
    %154 = math.tanh %153 : vector<2x32xf32>
    %155 = vector.extract_strided_slice %140 {offsets = [0, 96], sizes = [2, 32], strides = [1, 1]} : vector<2x128xf32> to vector<2x32xf32>
    %156 = arith.negf %155 : vector<2x32xf32>
    %157 = math.exp %156 : vector<2x32xf32>
    %cst_38 = arith.constant 1.000000e+00 : f32
    %158 = vector.broadcast %cst_38 : f32 to vector<2x32xf32>
    %159 = arith.addf %158, %157 : vector<2x32xf32>
    %160 = arith.divf %158, %159 : vector<2x32xf32>
    %161 = arith.mulf %152, %102 : vector<2x32xf32>
    %162 = arith.mulf %146, %154 : vector<2x32xf32>
    %163 = arith.addf %161, %162 : vector<2x32xf32>
    %164 = math.tanh %163 : vector<2x32xf32>
    %165 = arith.mulf %160, %164 : vector<2x32xf32>
    %166 = vector.extract_strided_slice %10 {offsets = [6, 0], sizes = [2, 128], strides = [1, 1]} : vector<16x128xf32> to vector<2x128xf32>
    %167 = arith.truncf %133 : vector<2x32xf32> to vector<2x32xbf16>
    %cst_39 = arith.constant dense<0.000000e+00> : vector<2x128xf32>
    %168 = tpu.matmul %167, %2, %cst_39 {dimension_numbers = #tpu.dot_dimension_numbers<[1], [0], [0], [1], [0, 0, 1, 1], [], []>} : vector<2x32xbf16>, vector<32x128xbf16>, vector<2x128xf32> -> vector<2x128xf32>
    %169 = arith.addf %166, %168 : vector<2x128xf32>
    %170 = vector.extract_strided_slice %169 {offsets = [0, 0], sizes = [2, 32], strides = [1, 1]} : vector<2x128xf32> to vector<2x32xf32>
    %171 = arith.negf %170 : vector<2x32xf32>
    %172 = math.exp %171 : vector<2x32xf32>
    %cst_40 = arith.constant 1.000000e+00 : f32
    %173 = vector.broadcast %cst_40 : f32 to vector<2x32xf32>
    %174 = arith.addf %173, %172 : vector<2x32xf32>
    %175 = arith.divf %173, %174 : vector<2x32xf32>
    %176 = vector.extract_strided_slice %169 {offsets = [0, 32], sizes = [2, 32], strides = [1, 1]} : vector<2x128xf32> to vector<2x32xf32>
    %177 = arith.negf %176 : vector<2x32xf32>
    %178 = math.exp %177 : vector<2x32xf32>
    %cst_41 = arith.constant 1.000000e+00 : f32
    %179 = vector.broadcast %cst_41 : f32 to vector<2x32xf32>
    %180 = arith.addf %179, %178 : vector<2x32xf32>
    %181 = arith.divf %179, %180 : vector<2x32xf32>
    %182 = vector.extract_strided_slice %169 {offsets = [0, 64], sizes = [2, 32], strides = [1, 1]} : vector<2x128xf32> to vector<2x32xf32>
    %183 = math.tanh %182 : vector<2x32xf32>
    %184 = vector.extract_strided_slice %169 {offsets = [0, 96], sizes = [2, 32], strides = [1, 1]} : vector<2x128xf32> to vector<2x32xf32>
    %185 = arith.negf %184 : vector<2x32xf32>
    %186 = math.exp %185 : vector<2x32xf32>
    %cst_42 = arith.constant 1.000000e+00 : f32
    %187 = vector.broadcast %cst_42 : f32 to vector<2x32xf32>
    %188 = arith.addf %187, %186 : vector<2x32xf32>
    %189 = arith.divf %187, %188 : vector<2x32xf32>
    %190 = arith.mulf %181, %131 : vector<2x32xf32>
    %191 = arith.mulf %175, %183 : vector<2x32xf32>
    %192 = arith.addf %190, %191 : vector<2x32xf32>
    %193 = math.tanh %192 : vector<2x32xf32>
    %194 = arith.mulf %189, %193 : vector<2x32xf32>
    %195 = arith.truncf %133 : vector<2x32xf32> to vector<2x32xbf16>
    %cst_43 = arith.constant dense<0.000000e+00> : vector<2x128xf32>
    %196 = tpu.matmul %195, %1, %cst_43 {dimension_numbers = #tpu.dot_dimension_numbers<[1], [0], [0], [1], [0, 0, 1, 1], [], []>} : vector<2x32xbf16>, vector<32x128xbf16>, vector<2x128xf32> -> vector<2x128xf32>
    %197 = arith.truncf %165 : vector<2x32xf32> to vector<2x32xbf16>
    %cst_44 = arith.constant dense<0.000000e+00> : vector<2x128xf32>
    %198 = tpu.matmul %197, %3, %cst_44 {dimension_numbers = #tpu.dot_dimension_numbers<[1], [0], [0], [1], [0, 0, 1, 1], [], []>} : vector<2x32xbf16>, vector<32x128xbf16>, vector<2x128xf32> -> vector<2x128xf32>
    %199 = arith.addf %196, %198 : vector<2x128xf32>
    %200 = vector.broadcast %5 : vector<1x128xf32> to vector<2x128xf32>
    %201 = arith.addf %199, %200 : vector<2x128xf32>
    %202 = vector.extract_strided_slice %201 {offsets = [0, 0], sizes = [2, 32], strides = [1, 1]} : vector<2x128xf32> to vector<2x32xf32>
    %203 = arith.negf %202 : vector<2x32xf32>
    %204 = math.exp %203 : vector<2x32xf32>
    %cst_45 = arith.constant 1.000000e+00 : f32
    %205 = vector.broadcast %cst_45 : f32 to vector<2x32xf32>
    %206 = arith.addf %205, %204 : vector<2x32xf32>
    %207 = arith.divf %205, %206 : vector<2x32xf32>
    %208 = vector.extract_strided_slice %201 {offsets = [0, 32], sizes = [2, 32], strides = [1, 1]} : vector<2x128xf32> to vector<2x32xf32>
    %209 = arith.negf %208 : vector<2x32xf32>
    %210 = math.exp %209 : vector<2x32xf32>
    %cst_46 = arith.constant 1.000000e+00 : f32
    %211 = vector.broadcast %cst_46 : f32 to vector<2x32xf32>
    %212 = arith.addf %211, %210 : vector<2x32xf32>
    %213 = arith.divf %211, %212 : vector<2x32xf32>
    %214 = vector.extract_strided_slice %201 {offsets = [0, 64], sizes = [2, 32], strides = [1, 1]} : vector<2x128xf32> to vector<2x32xf32>
    %215 = math.tanh %214 : vector<2x32xf32>
    %216 = vector.extract_strided_slice %201 {offsets = [0, 96], sizes = [2, 32], strides = [1, 1]} : vector<2x128xf32> to vector<2x32xf32>
    %217 = arith.negf %216 : vector<2x32xf32>
    %218 = math.exp %217 : vector<2x32xf32>
    %cst_47 = arith.constant 1.000000e+00 : f32
    %219 = vector.broadcast %cst_47 : f32 to vector<2x32xf32>
    %220 = arith.addf %219, %218 : vector<2x32xf32>
    %221 = arith.divf %219, %220 : vector<2x32xf32>
    %222 = arith.mulf %213, %163 : vector<2x32xf32>
    %223 = arith.mulf %207, %215 : vector<2x32xf32>
    %224 = arith.addf %222, %223 : vector<2x32xf32>
    %225 = math.tanh %224 : vector<2x32xf32>
    %226 = arith.mulf %221, %225 : vector<2x32xf32>
    %227 = vector.extract_strided_slice %10 {offsets = [8, 0], sizes = [2, 128], strides = [1, 1]} : vector<16x128xf32> to vector<2x128xf32>
    %228 = arith.truncf %194 : vector<2x32xf32> to vector<2x32xbf16>
    %cst_48 = arith.constant dense<0.000000e+00> : vector<2x128xf32>
    %229 = tpu.matmul %228, %2, %cst_48 {dimension_numbers = #tpu.dot_dimension_numbers<[1], [0], [0], [1], [0, 0, 1, 1], [], []>} : vector<2x32xbf16>, vector<32x128xbf16>, vector<2x128xf32> -> vector<2x128xf32>
    %230 = arith.addf %227, %229 : vector<2x128xf32>
    %231 = vector.extract_strided_slice %230 {offsets = [0, 0], sizes = [2, 32], strides = [1, 1]} : vector<2x128xf32> to vector<2x32xf32>
    %232 = arith.negf %231 : vector<2x32xf32>
    %233 = math.exp %232 : vector<2x32xf32>
    %cst_49 = arith.constant 1.000000e+00 : f32
    %234 = vector.broadcast %cst_49 : f32 to vector<2x32xf32>
    %235 = arith.addf %234, %233 : vector<2x32xf32>
    %236 = arith.divf %234, %235 : vector<2x32xf32>
    %237 = vector.extract_strided_slice %230 {offsets = [0, 32], sizes = [2, 32], strides = [1, 1]} : vector<2x128xf32> to vector<2x32xf32>
    %238 = arith.negf %237 : vector<2x32xf32>
    %239 = math.exp %238 : vector<2x32xf32>
    %cst_50 = arith.constant 1.000000e+00 : f32
    %240 = vector.broadcast %cst_50 : f32 to vector<2x32xf32>
    %241 = arith.addf %240, %239 : vector<2x32xf32>
    %242 = arith.divf %240, %241 : vector<2x32xf32>
    %243 = vector.extract_strided_slice %230 {offsets = [0, 64], sizes = [2, 32], strides = [1, 1]} : vector<2x128xf32> to vector<2x32xf32>
    %244 = math.tanh %243 : vector<2x32xf32>
    %245 = vector.extract_strided_slice %230 {offsets = [0, 96], sizes = [2, 32], strides = [1, 1]} : vector<2x128xf32> to vector<2x32xf32>
    %246 = arith.negf %245 : vector<2x32xf32>
    %247 = math.exp %246 : vector<2x32xf32>
    %cst_51 = arith.constant 1.000000e+00 : f32
    %248 = vector.broadcast %cst_51 : f32 to vector<2x32xf32>
    %249 = arith.addf %248, %247 : vector<2x32xf32>
    %250 = arith.divf %248, %249 : vector<2x32xf32>
    %251 = arith.mulf %242, %192 : vector<2x32xf32>
    %252 = arith.mulf %236, %244 : vector<2x32xf32>
    %253 = arith.addf %251, %252 : vector<2x32xf32>
    %254 = math.tanh %253 : vector<2x32xf32>
    %255 = arith.mulf %250, %254 : vector<2x32xf32>
    %256 = arith.truncf %194 : vector<2x32xf32> to vector<2x32xbf16>
    %cst_52 = arith.constant dense<0.000000e+00> : vector<2x128xf32>
    %257 = tpu.matmul %256, %1, %cst_52 {dimension_numbers = #tpu.dot_dimension_numbers<[1], [0], [0], [1], [0, 0, 1, 1], [], []>} : vector<2x32xbf16>, vector<32x128xbf16>, vector<2x128xf32> -> vector<2x128xf32>
    %258 = arith.truncf %226 : vector<2x32xf32> to vector<2x32xbf16>
    %cst_53 = arith.constant dense<0.000000e+00> : vector<2x128xf32>
    %259 = tpu.matmul %258, %3, %cst_53 {dimension_numbers = #tpu.dot_dimension_numbers<[1], [0], [0], [1], [0, 0, 1, 1], [], []>} : vector<2x32xbf16>, vector<32x128xbf16>, vector<2x128xf32> -> vector<2x128xf32>
    %260 = arith.addf %257, %259 : vector<2x128xf32>
    %261 = vector.broadcast %5 : vector<1x128xf32> to vector<2x128xf32>
    %262 = arith.addf %260, %261 : vector<2x128xf32>
    %263 = vector.extract_strided_slice %262 {offsets = [0, 0], sizes = [2, 32], strides = [1, 1]} : vector<2x128xf32> to vector<2x32xf32>
    %264 = arith.negf %263 : vector<2x32xf32>
    %265 = math.exp %264 : vector<2x32xf32>
    %cst_54 = arith.constant 1.000000e+00 : f32
    %266 = vector.broadcast %cst_54 : f32 to vector<2x32xf32>
    %267 = arith.addf %266, %265 : vector<2x32xf32>
    %268 = arith.divf %266, %267 : vector<2x32xf32>
    %269 = vector.extract_strided_slice %262 {offsets = [0, 32], sizes = [2, 32], strides = [1, 1]} : vector<2x128xf32> to vector<2x32xf32>
    %270 = arith.negf %269 : vector<2x32xf32>
    %271 = math.exp %270 : vector<2x32xf32>
    %cst_55 = arith.constant 1.000000e+00 : f32
    %272 = vector.broadcast %cst_55 : f32 to vector<2x32xf32>
    %273 = arith.addf %272, %271 : vector<2x32xf32>
    %274 = arith.divf %272, %273 : vector<2x32xf32>
    %275 = vector.extract_strided_slice %262 {offsets = [0, 64], sizes = [2, 32], strides = [1, 1]} : vector<2x128xf32> to vector<2x32xf32>
    %276 = math.tanh %275 : vector<2x32xf32>
    %277 = vector.extract_strided_slice %262 {offsets = [0, 96], sizes = [2, 32], strides = [1, 1]} : vector<2x128xf32> to vector<2x32xf32>
    %278 = arith.negf %277 : vector<2x32xf32>
    %279 = math.exp %278 : vector<2x32xf32>
    %cst_56 = arith.constant 1.000000e+00 : f32
    %280 = vector.broadcast %cst_56 : f32 to vector<2x32xf32>
    %281 = arith.addf %280, %279 : vector<2x32xf32>
    %282 = arith.divf %280, %281 : vector<2x32xf32>
    %283 = arith.mulf %274, %224 : vector<2x32xf32>
    %284 = arith.mulf %268, %276 : vector<2x32xf32>
    %285 = arith.addf %283, %284 : vector<2x32xf32>
    %286 = math.tanh %285 : vector<2x32xf32>
    %287 = arith.mulf %282, %286 : vector<2x32xf32>
    %288 = vector.extract_strided_slice %10 {offsets = [10, 0], sizes = [2, 128], strides = [1, 1]} : vector<16x128xf32> to vector<2x128xf32>
    %289 = arith.truncf %255 : vector<2x32xf32> to vector<2x32xbf16>
    %cst_57 = arith.constant dense<0.000000e+00> : vector<2x128xf32>
    %290 = tpu.matmul %289, %2, %cst_57 {dimension_numbers = #tpu.dot_dimension_numbers<[1], [0], [0], [1], [0, 0, 1, 1], [], []>} : vector<2x32xbf16>, vector<32x128xbf16>, vector<2x128xf32> -> vector<2x128xf32>
    %291 = arith.addf %288, %290 : vector<2x128xf32>
    %292 = vector.extract_strided_slice %291 {offsets = [0, 0], sizes = [2, 32], strides = [1, 1]} : vector<2x128xf32> to vector<2x32xf32>
    %293 = arith.negf %292 : vector<2x32xf32>
    %294 = math.exp %293 : vector<2x32xf32>
    %cst_58 = arith.constant 1.000000e+00 : f32
    %295 = vector.broadcast %cst_58 : f32 to vector<2x32xf32>
    %296 = arith.addf %295, %294 : vector<2x32xf32>
    %297 = arith.divf %295, %296 : vector<2x32xf32>
    %298 = vector.extract_strided_slice %291 {offsets = [0, 32], sizes = [2, 32], strides = [1, 1]} : vector<2x128xf32> to vector<2x32xf32>
    %299 = arith.negf %298 : vector<2x32xf32>
    %300 = math.exp %299 : vector<2x32xf32>
    %cst_59 = arith.constant 1.000000e+00 : f32
    %301 = vector.broadcast %cst_59 : f32 to vector<2x32xf32>
    %302 = arith.addf %301, %300 : vector<2x32xf32>
    %303 = arith.divf %301, %302 : vector<2x32xf32>
    %304 = vector.extract_strided_slice %291 {offsets = [0, 64], sizes = [2, 32], strides = [1, 1]} : vector<2x128xf32> to vector<2x32xf32>
    %305 = math.tanh %304 : vector<2x32xf32>
    %306 = vector.extract_strided_slice %291 {offsets = [0, 96], sizes = [2, 32], strides = [1, 1]} : vector<2x128xf32> to vector<2x32xf32>
    %307 = arith.negf %306 : vector<2x32xf32>
    %308 = math.exp %307 : vector<2x32xf32>
    %cst_60 = arith.constant 1.000000e+00 : f32
    %309 = vector.broadcast %cst_60 : f32 to vector<2x32xf32>
    %310 = arith.addf %309, %308 : vector<2x32xf32>
    %311 = arith.divf %309, %310 : vector<2x32xf32>
    %312 = arith.mulf %303, %253 : vector<2x32xf32>
    %313 = arith.mulf %297, %305 : vector<2x32xf32>
    %314 = arith.addf %312, %313 : vector<2x32xf32>
    %315 = math.tanh %314 : vector<2x32xf32>
    %316 = arith.mulf %311, %315 : vector<2x32xf32>
    %317 = arith.truncf %255 : vector<2x32xf32> to vector<2x32xbf16>
    %cst_61 = arith.constant dense<0.000000e+00> : vector<2x128xf32>
    %318 = tpu.matmul %317, %1, %cst_61 {dimension_numbers = #tpu.dot_dimension_numbers<[1], [0], [0], [1], [0, 0, 1, 1], [], []>} : vector<2x32xbf16>, vector<32x128xbf16>, vector<2x128xf32> -> vector<2x128xf32>
    %319 = arith.truncf %287 : vector<2x32xf32> to vector<2x32xbf16>
    %cst_62 = arith.constant dense<0.000000e+00> : vector<2x128xf32>
    %320 = tpu.matmul %319, %3, %cst_62 {dimension_numbers = #tpu.dot_dimension_numbers<[1], [0], [0], [1], [0, 0, 1, 1], [], []>} : vector<2x32xbf16>, vector<32x128xbf16>, vector<2x128xf32> -> vector<2x128xf32>
    %321 = arith.addf %318, %320 : vector<2x128xf32>
    %322 = vector.broadcast %5 : vector<1x128xf32> to vector<2x128xf32>
    %323 = arith.addf %321, %322 : vector<2x128xf32>
    %324 = vector.extract_strided_slice %323 {offsets = [0, 0], sizes = [2, 32], strides = [1, 1]} : vector<2x128xf32> to vector<2x32xf32>
    %325 = arith.negf %324 : vector<2x32xf32>
    %326 = math.exp %325 : vector<2x32xf32>
    %cst_63 = arith.constant 1.000000e+00 : f32
    %327 = vector.broadcast %cst_63 : f32 to vector<2x32xf32>
    %328 = arith.addf %327, %326 : vector<2x32xf32>
    %329 = arith.divf %327, %328 : vector<2x32xf32>
    %330 = vector.extract_strided_slice %323 {offsets = [0, 32], sizes = [2, 32], strides = [1, 1]} : vector<2x128xf32> to vector<2x32xf32>
    %331 = arith.negf %330 : vector<2x32xf32>
    %332 = math.exp %331 : vector<2x32xf32>
    %cst_64 = arith.constant 1.000000e+00 : f32
    %333 = vector.broadcast %cst_64 : f32 to vector<2x32xf32>
    %334 = arith.addf %333, %332 : vector<2x32xf32>
    %335 = arith.divf %333, %334 : vector<2x32xf32>
    %336 = vector.extract_strided_slice %323 {offsets = [0, 64], sizes = [2, 32], strides = [1, 1]} : vector<2x128xf32> to vector<2x32xf32>
    %337 = math.tanh %336 : vector<2x32xf32>
    %338 = vector.extract_strided_slice %323 {offsets = [0, 96], sizes = [2, 32], strides = [1, 1]} : vector<2x128xf32> to vector<2x32xf32>
    %339 = arith.negf %338 : vector<2x32xf32>
    %340 = math.exp %339 : vector<2x32xf32>
    %cst_65 = arith.constant 1.000000e+00 : f32
    %341 = vector.broadcast %cst_65 : f32 to vector<2x32xf32>
    %342 = arith.addf %341, %340 : vector<2x32xf32>
    %343 = arith.divf %341, %342 : vector<2x32xf32>
    %344 = arith.mulf %335, %285 : vector<2x32xf32>
    %345 = arith.mulf %329, %337 : vector<2x32xf32>
    %346 = arith.addf %344, %345 : vector<2x32xf32>
    %347 = math.tanh %346 : vector<2x32xf32>
    %348 = arith.mulf %343, %347 : vector<2x32xf32>
    %349 = vector.extract_strided_slice %10 {offsets = [12, 0], sizes = [2, 128], strides = [1, 1]} : vector<16x128xf32> to vector<2x128xf32>
    %350 = arith.truncf %316 : vector<2x32xf32> to vector<2x32xbf16>
    %cst_66 = arith.constant dense<0.000000e+00> : vector<2x128xf32>
    %351 = tpu.matmul %350, %2, %cst_66 {dimension_numbers = #tpu.dot_dimension_numbers<[1], [0], [0], [1], [0, 0, 1, 1], [], []>} : vector<2x32xbf16>, vector<32x128xbf16>, vector<2x128xf32> -> vector<2x128xf32>
    %352 = arith.addf %349, %351 : vector<2x128xf32>
    %353 = vector.extract_strided_slice %352 {offsets = [0, 0], sizes = [2, 32], strides = [1, 1]} : vector<2x128xf32> to vector<2x32xf32>
    %354 = arith.negf %353 : vector<2x32xf32>
    %355 = math.exp %354 : vector<2x32xf32>
    %cst_67 = arith.constant 1.000000e+00 : f32
    %356 = vector.broadcast %cst_67 : f32 to vector<2x32xf32>
    %357 = arith.addf %356, %355 : vector<2x32xf32>
    %358 = arith.divf %356, %357 : vector<2x32xf32>
    %359 = vector.extract_strided_slice %352 {offsets = [0, 32], sizes = [2, 32], strides = [1, 1]} : vector<2x128xf32> to vector<2x32xf32>
    %360 = arith.negf %359 : vector<2x32xf32>
    %361 = math.exp %360 : vector<2x32xf32>
    %cst_68 = arith.constant 1.000000e+00 : f32
    %362 = vector.broadcast %cst_68 : f32 to vector<2x32xf32>
    %363 = arith.addf %362, %361 : vector<2x32xf32>
    %364 = arith.divf %362, %363 : vector<2x32xf32>
    %365 = vector.extract_strided_slice %352 {offsets = [0, 64], sizes = [2, 32], strides = [1, 1]} : vector<2x128xf32> to vector<2x32xf32>
    %366 = math.tanh %365 : vector<2x32xf32>
    %367 = vector.extract_strided_slice %352 {offsets = [0, 96], sizes = [2, 32], strides = [1, 1]} : vector<2x128xf32> to vector<2x32xf32>
    %368 = arith.negf %367 : vector<2x32xf32>
    %369 = math.exp %368 : vector<2x32xf32>
    %cst_69 = arith.constant 1.000000e+00 : f32
    %370 = vector.broadcast %cst_69 : f32 to vector<2x32xf32>
    %371 = arith.addf %370, %369 : vector<2x32xf32>
    %372 = arith.divf %370, %371 : vector<2x32xf32>
    %373 = arith.mulf %364, %314 : vector<2x32xf32>
    %374 = arith.mulf %358, %366 : vector<2x32xf32>
    %375 = arith.addf %373, %374 : vector<2x32xf32>
    %376 = math.tanh %375 : vector<2x32xf32>
    %377 = arith.mulf %372, %376 : vector<2x32xf32>
    %378 = arith.truncf %316 : vector<2x32xf32> to vector<2x32xbf16>
    %cst_70 = arith.constant dense<0.000000e+00> : vector<2x128xf32>
    %379 = tpu.matmul %378, %1, %cst_70 {dimension_numbers = #tpu.dot_dimension_numbers<[1], [0], [0], [1], [0, 0, 1, 1], [], []>} : vector<2x32xbf16>, vector<32x128xbf16>, vector<2x128xf32> -> vector<2x128xf32>
    %380 = arith.truncf %348 : vector<2x32xf32> to vector<2x32xbf16>
    %cst_71 = arith.constant dense<0.000000e+00> : vector<2x128xf32>
    %381 = tpu.matmul %380, %3, %cst_71 {dimension_numbers = #tpu.dot_dimension_numbers<[1], [0], [0], [1], [0, 0, 1, 1], [], []>} : vector<2x32xbf16>, vector<32x128xbf16>, vector<2x128xf32> -> vector<2x128xf32>
    %382 = arith.addf %379, %381 : vector<2x128xf32>
    %383 = vector.broadcast %5 : vector<1x128xf32> to vector<2x128xf32>
    %384 = arith.addf %382, %383 : vector<2x128xf32>
    %385 = vector.extract_strided_slice %384 {offsets = [0, 0], sizes = [2, 32], strides = [1, 1]} : vector<2x128xf32> to vector<2x32xf32>
    %386 = arith.negf %385 : vector<2x32xf32>
    %387 = math.exp %386 : vector<2x32xf32>
    %cst_72 = arith.constant 1.000000e+00 : f32
    %388 = vector.broadcast %cst_72 : f32 to vector<2x32xf32>
    %389 = arith.addf %388, %387 : vector<2x32xf32>
    %390 = arith.divf %388, %389 : vector<2x32xf32>
    %391 = vector.extract_strided_slice %384 {offsets = [0, 32], sizes = [2, 32], strides = [1, 1]} : vector<2x128xf32> to vector<2x32xf32>
    %392 = arith.negf %391 : vector<2x32xf32>
    %393 = math.exp %392 : vector<2x32xf32>
    %cst_73 = arith.constant 1.000000e+00 : f32
    %394 = vector.broadcast %cst_73 : f32 to vector<2x32xf32>
    %395 = arith.addf %394, %393 : vector<2x32xf32>
    %396 = arith.divf %394, %395 : vector<2x32xf32>
    %397 = vector.extract_strided_slice %384 {offsets = [0, 64], sizes = [2, 32], strides = [1, 1]} : vector<2x128xf32> to vector<2x32xf32>
    %398 = math.tanh %397 : vector<2x32xf32>
    %399 = vector.extract_strided_slice %384 {offsets = [0, 96], sizes = [2, 32], strides = [1, 1]} : vector<2x128xf32> to vector<2x32xf32>
    %400 = arith.negf %399 : vector<2x32xf32>
    %401 = math.exp %400 : vector<2x32xf32>
    %cst_74 = arith.constant 1.000000e+00 : f32
    %402 = vector.broadcast %cst_74 : f32 to vector<2x32xf32>
    %403 = arith.addf %402, %401 : vector<2x32xf32>
    %404 = arith.divf %402, %403 : vector<2x32xf32>
    %405 = arith.mulf %396, %346 : vector<2x32xf32>
    %406 = arith.mulf %390, %398 : vector<2x32xf32>
    %407 = arith.addf %405, %406 : vector<2x32xf32>
    %408 = math.tanh %407 : vector<2x32xf32>
    %409 = arith.mulf %404, %408 : vector<2x32xf32>
    %410 = vector.extract_strided_slice %10 {offsets = [14, 0], sizes = [2, 128], strides = [1, 1]} : vector<16x128xf32> to vector<2x128xf32>
    %411 = arith.truncf %377 : vector<2x32xf32> to vector<2x32xbf16>
    %cst_75 = arith.constant dense<0.000000e+00> : vector<2x128xf32>
    %412 = tpu.matmul %411, %2, %cst_75 {dimension_numbers = #tpu.dot_dimension_numbers<[1], [0], [0], [1], [0, 0, 1, 1], [], []>} : vector<2x32xbf16>, vector<32x128xbf16>, vector<2x128xf32> -> vector<2x128xf32>
    %413 = arith.addf %410, %412 : vector<2x128xf32>
    %414 = vector.extract_strided_slice %413 {offsets = [0, 0], sizes = [2, 32], strides = [1, 1]} : vector<2x128xf32> to vector<2x32xf32>
    %415 = arith.negf %414 : vector<2x32xf32>
    %416 = math.exp %415 : vector<2x32xf32>
    %cst_76 = arith.constant 1.000000e+00 : f32
    %417 = vector.broadcast %cst_76 : f32 to vector<2x32xf32>
    %418 = arith.addf %417, %416 : vector<2x32xf32>
    %419 = arith.divf %417, %418 : vector<2x32xf32>
    %420 = vector.extract_strided_slice %413 {offsets = [0, 32], sizes = [2, 32], strides = [1, 1]} : vector<2x128xf32> to vector<2x32xf32>
    %421 = arith.negf %420 : vector<2x32xf32>
    %422 = math.exp %421 : vector<2x32xf32>
    %cst_77 = arith.constant 1.000000e+00 : f32
    %423 = vector.broadcast %cst_77 : f32 to vector<2x32xf32>
    %424 = arith.addf %423, %422 : vector<2x32xf32>
    %425 = arith.divf %423, %424 : vector<2x32xf32>
    %426 = vector.extract_strided_slice %413 {offsets = [0, 64], sizes = [2, 32], strides = [1, 1]} : vector<2x128xf32> to vector<2x32xf32>
    %427 = math.tanh %426 : vector<2x32xf32>
    %428 = vector.extract_strided_slice %413 {offsets = [0, 96], sizes = [2, 32], strides = [1, 1]} : vector<2x128xf32> to vector<2x32xf32>
    %429 = arith.negf %428 : vector<2x32xf32>
    %430 = math.exp %429 : vector<2x32xf32>
    %cst_78 = arith.constant 1.000000e+00 : f32
    %431 = vector.broadcast %cst_78 : f32 to vector<2x32xf32>
    %432 = arith.addf %431, %430 : vector<2x32xf32>
    %433 = arith.divf %431, %432 : vector<2x32xf32>
    %434 = arith.mulf %425, %375 : vector<2x32xf32>
    %435 = arith.mulf %419, %427 : vector<2x32xf32>
    %436 = arith.addf %434, %435 : vector<2x32xf32>
    %437 = math.tanh %436 : vector<2x32xf32>
    %438 = arith.mulf %433, %437 : vector<2x32xf32>
    %439 = arith.truncf %377 : vector<2x32xf32> to vector<2x32xbf16>
    %cst_79 = arith.constant dense<0.000000e+00> : vector<2x128xf32>
    %440 = tpu.matmul %439, %1, %cst_79 {dimension_numbers = #tpu.dot_dimension_numbers<[1], [0], [0], [1], [0, 0, 1, 1], [], []>} : vector<2x32xbf16>, vector<32x128xbf16>, vector<2x128xf32> -> vector<2x128xf32>
    %441 = arith.truncf %409 : vector<2x32xf32> to vector<2x32xbf16>
    %cst_80 = arith.constant dense<0.000000e+00> : vector<2x128xf32>
    %442 = tpu.matmul %441, %3, %cst_80 {dimension_numbers = #tpu.dot_dimension_numbers<[1], [0], [0], [1], [0, 0, 1, 1], [], []>} : vector<2x32xbf16>, vector<32x128xbf16>, vector<2x128xf32> -> vector<2x128xf32>
    %443 = arith.addf %440, %442 : vector<2x128xf32>
    %444 = vector.broadcast %5 : vector<1x128xf32> to vector<2x128xf32>
    %445 = arith.addf %443, %444 : vector<2x128xf32>
    %446 = vector.extract_strided_slice %445 {offsets = [0, 0], sizes = [2, 32], strides = [1, 1]} : vector<2x128xf32> to vector<2x32xf32>
    %447 = arith.negf %446 : vector<2x32xf32>
    %448 = math.exp %447 : vector<2x32xf32>
    %cst_81 = arith.constant 1.000000e+00 : f32
    %449 = vector.broadcast %cst_81 : f32 to vector<2x32xf32>
    %450 = arith.addf %449, %448 : vector<2x32xf32>
    %451 = arith.divf %449, %450 : vector<2x32xf32>
    %452 = vector.extract_strided_slice %445 {offsets = [0, 32], sizes = [2, 32], strides = [1, 1]} : vector<2x128xf32> to vector<2x32xf32>
    %453 = arith.negf %452 : vector<2x32xf32>
    %454 = math.exp %453 : vector<2x32xf32>
    %cst_82 = arith.constant 1.000000e+00 : f32
    %455 = vector.broadcast %cst_82 : f32 to vector<2x32xf32>
    %456 = arith.addf %455, %454 : vector<2x32xf32>
    %457 = arith.divf %455, %456 : vector<2x32xf32>
    %458 = vector.extract_strided_slice %445 {offsets = [0, 64], sizes = [2, 32], strides = [1, 1]} : vector<2x128xf32> to vector<2x32xf32>
    %459 = math.tanh %458 : vector<2x32xf32>
    %460 = vector.extract_strided_slice %445 {offsets = [0, 96], sizes = [2, 32], strides = [1, 1]} : vector<2x128xf32> to vector<2x32xf32>
    %461 = arith.negf %460 : vector<2x32xf32>
    %462 = math.exp %461 : vector<2x32xf32>
    %cst_83 = arith.constant 1.000000e+00 : f32
    %463 = vector.broadcast %cst_83 : f32 to vector<2x32xf32>
    %464 = arith.addf %463, %462 : vector<2x32xf32>
    %465 = arith.divf %463, %464 : vector<2x32xf32>
    %466 = arith.mulf %457, %407 : vector<2x32xf32>
    %467 = arith.mulf %451, %459 : vector<2x32xf32>
    %468 = arith.addf %466, %467 : vector<2x32xf32>
    %469 = math.tanh %468 : vector<2x32xf32>
    %470 = arith.mulf %465, %469 : vector<2x32xf32>
    %471 = arith.truncf %438 : vector<2x32xf32> to vector<2x32xbf16>
    %cst_84 = arith.constant dense<0.000000e+00> : vector<2x128xf32>
    %472 = tpu.matmul %471, %1, %cst_84 {dimension_numbers = #tpu.dot_dimension_numbers<[1], [0], [0], [1], [0, 0, 1, 1], [], []>} : vector<2x32xbf16>, vector<32x128xbf16>, vector<2x128xf32> -> vector<2x128xf32>
    %473 = arith.truncf %470 : vector<2x32xf32> to vector<2x32xbf16>
    %cst_85 = arith.constant dense<0.000000e+00> : vector<2x128xf32>
    %474 = tpu.matmul %473, %3, %cst_85 {dimension_numbers = #tpu.dot_dimension_numbers<[1], [0], [0], [1], [0, 0, 1, 1], [], []>} : vector<2x32xbf16>, vector<32x128xbf16>, vector<2x128xf32> -> vector<2x128xf32>
    %475 = arith.addf %472, %474 : vector<2x128xf32>
    %476 = vector.broadcast %5 : vector<1x128xf32> to vector<2x128xf32>
    %477 = arith.addf %475, %476 : vector<2x128xf32>
    %478 = vector.extract_strided_slice %477 {offsets = [0, 0], sizes = [2, 32], strides = [1, 1]} : vector<2x128xf32> to vector<2x32xf32>
    %479 = arith.negf %478 : vector<2x32xf32>
    %480 = math.exp %479 : vector<2x32xf32>
    %cst_86 = arith.constant 1.000000e+00 : f32
    %481 = vector.broadcast %cst_86 : f32 to vector<2x32xf32>
    %482 = arith.addf %481, %480 : vector<2x32xf32>
    %483 = arith.divf %481, %482 : vector<2x32xf32>
    %484 = vector.extract_strided_slice %477 {offsets = [0, 32], sizes = [2, 32], strides = [1, 1]} : vector<2x128xf32> to vector<2x32xf32>
    %485 = arith.negf %484 : vector<2x32xf32>
    %486 = math.exp %485 : vector<2x32xf32>
    %cst_87 = arith.constant 1.000000e+00 : f32
    %487 = vector.broadcast %cst_87 : f32 to vector<2x32xf32>
    %488 = arith.addf %487, %486 : vector<2x32xf32>
    %489 = arith.divf %487, %488 : vector<2x32xf32>
    %490 = vector.extract_strided_slice %477 {offsets = [0, 64], sizes = [2, 32], strides = [1, 1]} : vector<2x128xf32> to vector<2x32xf32>
    %491 = math.tanh %490 : vector<2x32xf32>
    %492 = vector.extract_strided_slice %477 {offsets = [0, 96], sizes = [2, 32], strides = [1, 1]} : vector<2x128xf32> to vector<2x32xf32>
    %493 = arith.negf %492 : vector<2x32xf32>
    %494 = math.exp %493 : vector<2x32xf32>
    %cst_88 = arith.constant 1.000000e+00 : f32
    %495 = vector.broadcast %cst_88 : f32 to vector<2x32xf32>
    %496 = arith.addf %495, %494 : vector<2x32xf32>
    %497 = arith.divf %495, %496 : vector<2x32xf32>
    %498 = arith.mulf %489, %468 : vector<2x32xf32>
    %499 = arith.mulf %483, %491 : vector<2x32xf32>
    %500 = arith.addf %498, %499 : vector<2x32xf32>
    %501 = math.tanh %500 : vector<2x32xf32>
    %502 = arith.mulf %497, %501 : vector<2x32xf32>
    %503 = arith.truncf %502 : vector<2x32xf32> to vector<2x32xbf16>
    %c0_89 = arith.constant 0 : index
    %c0_90 = arith.constant 0 : index
    %504 = vector.load %arg7[%c0_89, %c0_90] : memref<32x4xbf16, #tpu.memory_space<vmem>>, vector<32x4xbf16>
    %cst_91 = arith.constant dense<0.000000e+00> : vector<2x4xf32>
    %505 = tpu.matmul %503, %504, %cst_91 {dimension_numbers = #tpu.dot_dimension_numbers<[1], [0], [0], [1], [0, 0, 1, 1], [], []>} : vector<2x32xbf16>, vector<32x4xbf16>, vector<2x4xf32> -> vector<2x4xf32>
    %c0_92 = arith.constant 0 : index
    %c0_93 = arith.constant 0 : index
    %506 = vector.load %arg8[%c0_92, %c0_93] : memref<1x4xf32, #tpu.memory_space<vmem>>, vector<1x4xf32>
    %507 = vector.broadcast %506 : vector<1x4xf32> to vector<2x4xf32>
    %508 = arith.addf %505, %507 : vector<2x4xf32>
    %c0_94 = arith.constant 0 : index
    %c0_95 = arith.constant 0 : index
    %509 = vector.load %arg9[%c0_94, %c0_95] : memref<2x4xf32, #tpu.memory_space<vmem>>, vector<2x4xf32>
    tpu.vector_store %arg9[%c0_94, %c0_95], %508 {strides = array<i32>} : memref<2x4xf32, #tpu.memory_space<vmem>>, vector<2x4xf32>,
    return
  }
}

</mosaic_0001>

<bundles_post_ra>
// kernel: lstm_model_forward.1
= control target key start
LH: loop header
LB: loop body
LE: loop exit
PB: predicated region body
PF: predicated region fallthrough
CT: control target
= control target key end

     0   :  { %14 = vsyncpa [#allocation3], 0  ;;  %s1922_s0 = inlined_call_operand.vmem [shape: f32[16,16], index: 0, kind: input, shape index: {}]   ;;  %s1923_s1 = inlined_call_operand.hbm [shape: bf16[16,128], index: 1, kind: input, shape index: {}]   ;;  %s1924_s2 = inlined_call_operand.vmem [shape: bf16[32,128], index: 2, kind: input, shape index: {}]   ;;  %s1925_s3 = inlined_call_operand.vmem [shape: f32[1,128], index: 3, kind: input, shape index: {}]   ;;  %s1926_s4 = inlined_call_operand.vmem [shape: bf16[32,128], index: 4, kind: input, shape index: {}]   ;;  %s1927_s5 = inlined_call_operand.vmem [shape: bf16[32,128], index: 5, kind: input, shape index: {}]   ;;  %s1928_s6 = inlined_call_operand.vmem [shape: f32[1,128], index: 6, kind: input, shape index: {}]   ;;  %s1929_s7 = inlined_call_operand.vmem [shape: bf16[32,4], index: 7, kind: input, shape index: {}]   ;;  %s1930_s8 = inlined_call_operand.hbm [shape: f32[1,4], index: 8, kind: input, shape index: {}]   ;;  %s1931_s9 = inlined_call_operand.hbm [shape: f32[2,4], index: 9, kind: output, shape index: {}]  }
   0x1   :  { %15 = vsyncpa [#allocation6], 0 }
   0x2   :  { %16 = vsyncpa [#allocation4], 0  ;;  %s23_s11 = sshll.u32 %s1923_s1, 4  ;;  %s1585_s12 = smov [#allocation2]   ;;  %s24_s11 = int_to_ptr.hbm [resolvable:$true] %s23_s11 }
   0x3   :  { %s25_s13 = sshll.u32 %s1585_s12, 4  ;;  %s49_s16 = sshll.u32 %s1930_s8, 4  ;;  %s26_s13 = int_to_ptr.vmem [resolvable:$true] %s25_s13  ;;  %s50_s16 = int_to_ptr.hbm [resolvable:$true] %s49_s16 }
   0x4   :  { %s1586_s17 = smov 64   ;;  %s1587_s18 = smov 4  }
   0x5   :  { %31 = dma.hbm_to_vmem [thread:$0]  %s24_s11, 128, %s26_s13, [#allocation3], %s1586_s17, %s1586_s17, %s1587_s18  }
   0x6   :  { %s1588_s19 = smov [#allocation5]  }
   0x7   :  { %s51_s20 = sshll.u32 %s1588_s19, 4  ;;  %s52_s20 = int_to_ptr.vmem [resolvable:$true] %s51_s20 }
   0x8   :  { %54 = dma.hbm_to_vmem [thread:$0]  %s50_s16, 16, %s52_s20, [#allocation6]  }
   0x9   :  { %1579 = dma.done.wait [#allocation3], 128  }
   0xa   :  { %1580 = vsyncadd [#allocation3], 4294967168 }
   0xb   :  { %1581 = dma.done.wait [#allocation6], 16  }
   0xc   :  { %1582 = vsyncadd [#allocation6], 4294967280  ;;  %v1359_v0 = vld [vmem:[#allocation2] sm:$0xff]  ;;  %v1653_v1 = vld [vmem:[%s1924_s2 + $0x8] sm:$0xff]  ;;  %vm92_vm0 = vcmask 130048   ;;  %v1589_v6 = vmov 0  }
   0xd   :  { %v80_v2 = vld [vmem:[%s1922_s0] sm:$0xff]  ;;  %v81_v3 = vld [vmem:[%s1922_s0 + $0x8] sm:$0xff]  ;;  %103 = vmatpush.bf16.msra.mxu0 %v1359_v0  ;;  %132 = vmatpush.bf16.msra.mxu1 %v1653_v1  ;;  %vm122_vm5 = vcmask 261120   ;;  %s1272_s8 = sshll.u32 %s1931_s9, 4  ;;  %s1273_s8 = int_to_ptr.hbm [resolvable:$true] %s1272_s8 }
   0xe   :  { %v82_v4 = vpack.c.bf16 %v81_v3, %v80_v2  ;;  %v1665_v5 = vld [vmem:[%s1924_s2] sm:$0xff]  ;;  %190 = vmatpush.bf16.msra.mxu2 %v1653_v1  ;;  %s1590_s2 = smov 32   ;;  %v1690_v33 = vld [vmem:[%s1927_s5 + $0x8] sm:$0xff] }
   0xf   :  { %v1675_v7 = vld [vmem:[%s1925_s3] ss:$0 sm:$0xff]  ;;  %v1695_v34 = vld [vmem:[%s1926_s4 + $0x8] sm:$0xff]  ;;  %259 = vmatpush.bf16.msra.mxu3 %v1690_v33 }
  0x10   :  { %1287 = vmatmul.msk.bf16.vlgmr.msra.gmra.mxu0 %vm92_vm0, %v82_v4  ;;  %v1701_v35 = vld [vmem:[%s1927_s5] sm:$0xff] }
  0x11   :  { %133 = vmatpush.bf16.msra.mxu1 %v1665_v5  ;;  %284 = vmatpush.bf16.msrb.mxu0 %v1695_v34  ;;  %v1707_v36 = vld [vmem:[%s1926_s4] sm:$0xff] }
  0x12   :  { %191 = vmatpush.bf16.msra.mxu2 %v1665_v5  ;;  %v1734_v50 = vld [vmem:[%s1928_s6] ss:$0 sm:$0xff] }
  0x13   :  { %260 = vmatpush.bf16.msra.mxu3 %v1701_v35 }
  0x14   :  { %134 = vmatmul.bf16.vlgmr.msra.gmra.mxu1 %v1589_v6 }
  0x15   :  { %346 = vmatpush.bf16.msrb.mxu1 %v1653_v1  ;;  %285 = vmatpush.bf16.msrb.mxu0 %v1707_v36 }
  0x16   :  { %410 = vmatpush.bf16.msrb.mxu2 %v1690_v33  ;;  %261 = vmatmul.bf16.vlgmr.msra.gmra.mxu3 %v1589_v6 }
  0x17   :  { %423 = vmatpush.bf16.msrb.mxu3 %v1695_v34 }
  0x19   :  { %347 = vmatpush.bf16.msrb.mxu1 %v1665_v5  ;;  %482 = vmatpush.bf16.msra.mxu0 %v1653_v1 }
  0x1a   :  { %411 = vmatpush.bf16.msrb.mxu2 %v1701_v35 }
  0x1b   :  { %424 = vmatpush.bf16.msrb.mxu3 %v1707_v36 }
  0x1d   :  { %546 = vmatpush.bf16.msra.mxu1 %v1690_v33  ;;  %483 = vmatpush.bf16.msra.mxu0 %v1665_v5 }
  0x1f   :  { %618 = vmatpush.bf16.msra.mxu3 %v1653_v1 }
  0x21   :  { %547 = vmatpush.bf16.msra.mxu1 %v1701_v35 }
  0x23   :  { %619 = vmatpush.bf16.msra.mxu3 %v1665_v5 }
  0x8d   :  { %v105_v8 = vpop.f32.mrf.mxu0 }
  0x8e   :  { %v1678_v9 = vadd.f32 %v1675_v7, %v105_v8 }
  0x91   :  { %v135_v10 = vpop.f32.mrf.mxu1 }
  0x92   :  { %v139_v11 = vadd.f32 %v135_v10, %v1678_v9 }
  0x94   :  { %1378 = vtanh.f32 %v139_v11  ;;  %v1296_v14 = vmul.f32 -1.442695, %v139_v11 }
  0x95   :  { %v1728_v43 = vpop.f32.mrf.mxu0 }
  0x96   :  { %1380 = vpow2.f32 %v1296_v14 }
  0x99   :  { %v137_v12 = vpop.f32.mrf.mxu1  ;;  %v262_v40 = vpop.f32.mrf.mxu3 }
  0x9a   :  { %v1379_v13 = vpop.eup %1378 }
  0x9b   :  { %162 = vrot.lane.b32.xlu0 %v1379_v13, %s1586_s17 }
  0x9c   :  { %v1381_v15 = vpop.eup %1380 }
  0x9d   :  { %v143_v16 = vadd.f32 1.0, %v1381_v15 }
  0x9f   :  { %1382 = vrcp.f32 %v143_v16  ;;  %v155_v22 = vand.u32 2147483648, %v143_v16  ;;  %vm149_vm2 = vweird.f32 %v143_v16  ;;  %v153_v23 = vand.u32 2147483647, %v143_v16 }
  0xa1   :  { %v156_v25 = vor.u32 1.1754944e-38, %v155_v22  ;;  %vm154_vm4 = vcmp.eq.f32.partialorder %v153_v23, 8.507059e+37  ;;  %v264_v42 = vpop.f32.mrf.mxu3 }
  0xa5   :  { %v1383_v17 = vpop.eup %1382 }
  0xa6   :  { %v145_v18 = vmul.f32 %v1383_v17, %v143_v16  ;;  %vm150_vm1 = vweird.f32 %v1383_v17 }
  0xa7   :  { %vm151_vm3 = vmor %vm149_vm2, %vm150_vm1 }
  0xa8   :  { %v146_v19 = vsub.f32 1.0, %v145_v18 }
  0xaa   :  { %v147_v20 = vmul.f32 %v1383_v17, %v146_v19 }
  0xac   :  { %v148_v21 = vadd.f32 %v1383_v17, %v147_v20 }
  0xae   :  { %v152_v24 = vsel %vm151_vm3, %v1383_v17, %v148_v21 }
  0xaf   :  { %v157_v27 = vsel %vm154_vm4, %v156_v25, %v152_v24 }
  0xb0   :  { %v160_v29 = vmul.f32 0.0, %v157_v27 }
 0x10d   :  { %v163_v26 = vpop.permute.xlu0 %162 }
 0x10e   :  { %v165_v28 = vmul.f32 %v163_v26, %v157_v27 }
 0x110   :  { %167 = vrot.lane.b32.xlu0 %v165_v28, %s1590_s2 }
 0x182   :  { %v168_v30 = vpop.permute.xlu0 %167 }
 0x183   :  { %v1683_v31 = vadd.f32 %v168_v30, %v160_v29 }
 0x185   :  { %1384 = vtanh.f32 %v1683_v31  ;;  %v222_v25 = vrot.slane %v1683_v31, 6 }
 0x18b   :  { %v1385_v32 = vpop.eup %1384 }
 0x18c   :  { %173 = vrot.lane.b32.xlu1 %v1385_v32, %s1586_s17 }
 0x1fe   :  { %v174_v37 = vpop.permute.xlu1 %173 }
 0x1ff   :  { %v176_v38 = vmul.f32 %v174_v37, %v157_v27 }
 0x201   :  { %v177_v39 = vpack.c.bf16 %v176_v38, %v176_v38 }
 0x203   :  { %179 = vrot.lane.b32.xlu1 %v177_v39, %s1590_s2 }
 0x275   :  { %v180_v41 = vpop.permute.xlu1 %179 }
 0x276   :  { %1297 = vmatmul.msk.bf16.vlgmr.msra.gmra.mxu2 %vm122_vm5, %v180_v41  ;;  %1315 = vmatmul.msk.bf16.vlgmr.msrb.gmra.mxu0 %vm122_vm5, %v180_v41 }
 0x277   :  { %559 = vmatpush.bf16.msra.mxu2 %v1695_v34  ;;  %679 = vmatpush.bf16.msrb.mxu0 %v1690_v33 }
 0x27b   :  { %560 = vmatpush.bf16.msra.mxu2 %v1707_v36  ;;  %680 = vmatpush.bf16.msrb.mxu0 %v1701_v35 }
 0x2f3   :  { %v287_v44 = vpop.f32.mrf.mxu0 }
 0x2f4   :  { %v288_v49 = vadd.f32 %v287_v44, %v262_v40 }
 0x2f6   :  { %v294_v52 = vadd.f32 %v1734_v50, %v288_v49 }
 0x2f8   :  { %v1316_v56 = vmul.f32 -1.442695, %v294_v52 }
 0x2f9   :  { %v193_v45 = vpop.f32.mrf.mxu2 }
 0x2fa   :  { %v198_v46 = vrot.slane %v193_v45, 6 }
 0x2fb   :  { %v289_v47 = vpop.f32.mrf.mxu0 }
 0x2fc   :  { %v200_v48 = vadd.f32 %v198_v46, %v1678_v9 }
 0x2fe   :  { %1386 = vtanh.f32 %v200_v48  ;;  %v1298_v55 = vmul.f32 -1.442695, %v200_v48 }
 0x2ff   :  { %1388 = vtanh.f32 %v294_v52 }
 0x300   :  { %1390 = vpow2.f32 %v1298_v55 }
 0x301   :  { %v195_v51 = vpop.f32.mrf.mxu2  ;;  %1392 = vpow2.f32 %v1316_v56 }
 0x304   :  { %v1387_v53 = vpop.eup %1386 }
 0x305   :  { %226 = vrot.lane.b32.xlu2 %v1387_v53, %s1586_s17  ;;  %v1389_v54 = vpop.eup %1388 }
 0x306   :  { %v1391_v57 = vpop.eup %1390 }
 0x307   :  { %v204_v58 = vadd.f32 1.0, %v1391_v57  ;;  %v1393_v59 = vpop.eup %1392 }
 0x308   :  { %v298_v60 = vadd.f32 1.0, %v1393_v59 }
 0x309   :  { %1394 = vrcp.f32 %v204_v58  ;;  %v216_v8 = vand.u32 2147483648, %v204_v58  ;;  %vm210_vm7 = vweird.f32 %v204_v58  ;;  %v214_v10 = vand.u32 2147483647, %v204_v58 }
 0x30a   :  { %1396 = vrcp.f32 %v298_v60  ;;  %v310_v18 = vand.u32 2147483648, %v298_v60  ;;  %vm304_vm11 = vweird.f32 %v298_v60  ;;  %v308_v19 = vand.u32 2147483647, %v298_v60 }
 0x30b   :  { %v217_v13 = vor.u32 1.1754944e-38, %v216_v8  ;;  %vm215_vm9 = vcmp.eq.f32.partialorder %v214_v10, 8.507059e+37 }
 0x30c   :  { %v311_v21 = vor.u32 1.1754944e-38, %v310_v18  ;;  %vm309_vm13 = vcmp.eq.f32.partialorder %v308_v19, 8.507059e+37 }
 0x30d   :  { %317 = vrot.lane.b32.xlu2 %v1389_v54, %s1586_s17 }
 0x30f   :  { %v1395_v61 = vpop.eup %1394 }
 0x310   :  { %v206_v62 = vmul.f32 %v1395_v61, %v204_v58  ;;  %v1397_v0 = vpop.eup %1396  ;;  %vm211_vm6 = vweird.f32 %v1395_v61 }
 0x311   :  { %v300_v3 = vmul.f32 %v1397_v0, %v298_v60  ;;  %vm212_vm8 = vmor %vm210_vm7, %vm211_vm6  ;;  %vm305_vm10 = vweird.f32 %v1397_v0 }
 0x312   :  { %v207_v63 = vsub.f32 1.0, %v206_v62  ;;  %vm306_vm12 = vmor %vm304_vm11, %vm305_vm10 }
 0x313   :  { %v301_v6 = vsub.f32 1.0, %v300_v3 }
 0x314   :  { %v208_v2 = vmul.f32 %v1395_v61, %v207_v63 }
 0x315   :  { %v302_v12 = vmul.f32 %v1397_v0, %v301_v6 }
 0x316   :  { %v209_v4 = vadd.f32 %v1395_v61, %v208_v2 }
 0x317   :  { %v303_v17 = vadd.f32 %v1397_v0, %v302_v12 }
 0x318   :  { %v213_v11 = vsel %vm212_vm8, %v1395_v61, %v209_v4 }
 0x319   :  { %v218_v15 = vsel %vm215_vm9, %v217_v13, %v213_v11  ;;  %v307_v20 = vsel %vm306_vm12, %v1397_v0, %v303_v17 }
 0x31a   :  { %v312_v22 = vsel %vm309_vm13, %v311_v21, %v307_v20  ;;  %v224_v26 = vmul.f32 %v222_v25, %v218_v15 }
 0x31b   :  { %v315_v29 = vmul.f32 0.0, %v312_v22 }
 0x35f   :  { %v227_v14 = vpop.permute.xlu2 %226 }
 0x360   :  { %v229_v16 = vmul.f32 %v227_v14, %v218_v15 }
 0x362   :  { %231 = vrot.lane.b32.xlu0 %v229_v16, %s1590_s2 }
 0x367   :  { %v318_v23 = vpop.permute.xlu2 %317 }
 0x368   :  { %v320_v24 = vmul.f32 %v318_v23, %v312_v22 }
 0x36a   :  { %322 = vrot.lane.b32.xlu1 %v320_v24, %s1590_s2 }
 0x3d4   :  { %v232_v27 = vpop.permute.xlu0 %231 }
 0x3d5   :  { %v1742_v28 = vadd.f32 %v232_v27, %v224_v26 }
 0x3d7   :  { %1398 = vtanh.f32 %v1742_v28 }
 0x3dc   :  { %v323_v30 = vpop.permute.xlu1 %322 }
 0x3dd   :  { %v1399_v32 = vpop.eup %1398  ;;  %v1745_v37 = vadd.f32 %v323_v30, %v315_v29 }
 0x3de   :  { %237 = vrot.lane.b32.xlu2 %v1399_v32, %s1586_s17 }
 0x3df   :  { %1400 = vtanh.f32 %v1745_v37 }
 0x3e5   :  { %v1401_v38 = vpop.eup %1400 }
 0x3e6   :  { %328 = vrot.lane.b32.xlu0 %v1401_v38, %s1586_s17  ;;  %v378_v38 = vrot.slane %v1742_v28, 6 }
 0x438   :  { %v238_v39 = vpop.permute.xlu2 %237 }
 0x439   :  { %v240_v31 = vmul.f32 %v238_v39, %v218_v15 }
 0x43b   :  { %v332_v40 = vpack.c.bf16 %v240_v31, %v240_v31 }
 0x43d   :  { %v334_v41 = vrot.slane %v332_v40, 1 }
 0x43f   :  { %335 = vrot.lane.b32.xlu1 %v334_v41, %s1590_s2 }
 0x458   :  { %v329_v42 = vpop.permute.xlu0 %328 }
 0x459   :  { %v331_v44 = vmul.f32 %v329_v42, %v312_v22 }
 0x45b   :  { %v397_v45 = vpack.c.bf16 %v331_v44, %v331_v44 }
 0x45d   :  { %399 = vrot.lane.b32.xlu2 %v397_v45, %s1590_s2 }
 0x4b1   :  { %v336_v46 = vpop.permute.xlu1 %335 }
 0x4b2   :  { %1317 = vmatmul.msk.bf16.vlgmr.msrb.gmra.mxu1 %vm122_vm5, %v336_v46  ;;  %1320 = vmatmul.msk.bf16.vlgmr.msrb.gmra.mxu3 %vm122_vm5, %v336_v46 }
 0x4b3   :  { %692 = vmatpush.bf16.msrb.mxu1 %v1695_v34  ;;  %814 = vmatpush.bf16.msrb.mxu3 %v1690_v33 }
 0x4b7   :  { %v400_v47 = vpop.permute.xlu2 %399  ;;  %693 = vmatpush.bf16.msrb.mxu1 %v1707_v36  ;;  %815 = vmatpush.bf16.msrb.mxu3 %v1701_v35 }
 0x4b8   :  { %1319 = vmatmul.msk.bf16.vlgmr.msrb.gmra.mxu2 %vm122_vm5, %v400_v47 }
 0x4b9   :  { %750 = vmatpush.bf16.msrb.mxu2 %v1653_v1 }
 0x4bd   :  { %751 = vmatpush.bf16.msrb.mxu2 %v1665_v5 }
 0x52f   :  { %v349_v48 = vpop.f32.mrf.mxu1 }
 0x530   :  { %v354_v49 = vrot.slane %v349_v48, 4 }
 0x532   :  { %v356_v51 = vadd.f32 %v354_v49, %v1678_v9 }
 0x534   :  { %1402 = vtanh.f32 %v356_v51  ;;  %v1318_v61 = vmul.f32 -1.442695, %v356_v51 }
 0x535   :  { %v426_v52 = vpop.f32.mrf.mxu3 }
 0x537   :  { %v351_v53 = vpop.f32.mrf.mxu1 }
 0x53a   :  { %v1403_v54 = vpop.eup %1402 }
 0x53b   :  { %382 = vrot.lane.b32.xlu0 %v1403_v54, %s1586_s17  ;;  %v413_v55 = vpop.f32.mrf.mxu2 }
 0x53c   :  { %v427_v56 = vadd.f32 %v426_v52, %v413_v55 }
 0x53d   :  { %v428_v57 = vpop.f32.mrf.mxu3 }
 0x53e   :  { %v430_v58 = vadd.f32 %v1734_v50, %v427_v56 }
 0x540   :  { %1404 = vtanh.f32 %v430_v58  ;;  %v1321_v63 = vmul.f32 -1.442695, %v430_v58 }
 0x541   :  { %1406 = vpow2.f32 %v1318_v61 }
 0x542   :  { %1408 = vpow2.f32 %v1321_v63 }
 0x543   :  { %v415_v59 = vpop.f32.mrf.mxu2 }
 0x546   :  { %v1405_v60 = vpop.eup %1404 }
 0x547   :  { %453 = vrot.lane.b32.xlu1 %v1405_v60, %s1586_s17  ;;  %v1407_v62 = vpop.eup %1406 }
 0x548   :  { %v360_v0 = vadd.f32 1.0, %v1407_v62  ;;  %v1409_v2 = vpop.eup %1408 }
 0x549   :  { %v434_v4 = vadd.f32 1.0, %v1409_v2 }
 0x54a   :  { %1410 = vrcp.f32 %v360_v0  ;;  %v372_v14 = vand.u32 2147483648, %v360_v0  ;;  %vm366_vm15 = vweird.f32 %v360_v0  ;;  %v370_v15 = vand.u32 2147483647, %v360_v0 }
 0x54b   :  { %1412 = vrcp.f32 %v434_v4  ;;  %v446_v24 = vand.u32 2147483648, %v434_v4  ;;  %vm440_vm3 = vweird.f32 %v434_v4  ;;  %v444_v25 = vand.u32 2147483647, %v434_v4 }
 0x54c   :  { %v373_v18 = vor.u32 1.1754944e-38, %v372_v14  ;;  %vm371_vm1 = vcmp.eq.f32.partialorder %v370_v15, 8.507059e+37 }
 0x54d   :  { %v447_v27 = vor.u32 1.1754944e-38, %v446_v24  ;;  %vm445_vm6 = vcmp.eq.f32.partialorder %v444_v25, 8.507059e+37 }
 0x550   :  { %v1411_v3 = vpop.eup %1410 }
 0x551   :  { %v362_v6 = vmul.f32 %v1411_v3, %v360_v0  ;;  %v1413_v11 = vpop.eup %1412  ;;  %vm367_vm14 = vweird.f32 %v1411_v3 }
 0x552   :  { %v436_v13 = vmul.f32 %v1413_v11, %v434_v4  ;;  %vm368_vm0 = vmor %vm366_vm15, %vm367_vm14  ;;  %vm441_vm2 = vweird.f32 %v1413_v11 }
 0x553   :  { %v363_v8 = vsub.f32 1.0, %v362_v6  ;;  %vm442_vm4 = vmor %vm440_vm3, %vm441_vm2 }
 0x554   :  { %v437_v17 = vsub.f32 1.0, %v436_v13 }
 0x555   :  { %v364_v10 = vmul.f32 %v1411_v3, %v363_v8 }
 0x556   :  { %v438_v22 = vmul.f32 %v1413_v11, %v437_v17 }
 0x557   :  { %v365_v12 = vadd.f32 %v1411_v3, %v364_v10 }
 0x558   :  { %v439_v23 = vadd.f32 %v1413_v11, %v438_v22 }
 0x559   :  { %v369_v16 = vsel %vm368_vm0, %v1411_v3, %v365_v12 }
 0x55a   :  { %v374_v20 = vsel %vm371_vm1, %v373_v18, %v369_v16  ;;  %v443_v26 = vsel %vm442_vm4, %v1413_v11, %v439_v23 }
 0x55b   :  { %v448_v30 = vsel %vm445_vm6, %v447_v27, %v443_v26  ;;  %v380_v39 = vmul.f32 %v378_v38, %v374_v20 }
 0x55c   :  { %v451_v42 = vmul.f32 %v448_v30, %v1745_v37 }
 0x5ad   :  { %v383_v19 = vpop.permute.xlu0 %382 }
 0x5ae   :  { %v385_v21 = vmul.f32 %v383_v19, %v374_v20 }
 0x5b0   :  { %387 = vrot.lane.b32.xlu2 %v385_v21, %s1590_s2 }
 0x5b9   :  { %v454_v29 = vpop.permute.xlu1 %453 }
 0x5ba   :  { %v456_v32 = vmul.f32 %v454_v29, %v448_v30 }
 0x5bc   :  { %458 = vrot.lane.b32.xlu0 %v456_v32, %s1590_s2 }
 0x60a   :  { %v388_v31 = vpop.permute.xlu2 %387 }
 0x60b   :  { %v1768_v40 = vadd.f32 %v388_v31, %v380_v39 }
 0x60d   :  { %1414 = vtanh.f32 %v1768_v40 }
 0x613   :  { %v1415_v41 = vpop.eup %1414 }
 0x614   :  { %393 = vrot.lane.b32.xlu1 %v1415_v41, %s1586_s17 }
 0x62e   :  { %v459_v44 = vpop.permute.xlu0 %458 }
 0x62f   :  { %v1773_v45 = vadd.f32 %v459_v44, %v451_v42  ;;  %v514_v44 = vrot.slane %v1768_v40, 6 }
 0x631   :  { %1416 = vtanh.f32 %v1773_v45 }
 0x637   :  { %v1417_v46 = vpop.eup %1416 }
 0x638   :  { %464 = vrot.lane.b32.xlu2 %v1417_v46, %s1586_s17 }
 0x686   :  { %v394_v28 = vpop.permute.xlu1 %393 }
 0x687   :  { %v396_v47 = vmul.f32 %v394_v28, %v374_v20 }
 0x689   :  { %v468_v48 = vpack.c.bf16 %v396_v47, %v396_v47 }
 0x68b   :  { %v470_v49 = vrot.slane %v468_v48, 2 }
 0x68d   :  { %471 = vrot.lane.b32.xlu0 %v470_v49, %s1590_s2 }
 0x692   :  { %v465_v51 = vpop.permute.xlu2 %464 }
 0x693   :  { %v467_v52 = vmul.f32 %v465_v51, %v448_v30 }
 0x695   :  { %v533_v53 = vpack.c.bf16 %v467_v52, %v467_v52 }
 0x697   :  { %535 = vrot.lane.b32.xlu1 %v533_v53, %s1590_s2 }
 0x6ff   :  { %v472_v37 = vpop.permute.xlu0 %471 }
 0x700   :  { %1322 = vmatmul.msk.bf16.vlgmr.msra.gmra.mxu0 %vm122_vm5, %v472_v37  ;;  %1325 = vmatmul.msk.bf16.vlgmr.msra.gmra.mxu2 %vm122_vm5, %v472_v37 }
 0x701   :  { %827 = vmatpush.bf16.msra.mxu0 %v1695_v34  ;;  %950 = vmatpush.bf16.msra.mxu2 %v1690_v33 }
 0x705   :  { %828 = vmatpush.bf16.msra.mxu0 %v1707_v36  ;;  %951 = vmatpush.bf16.msra.mxu2 %v1701_v35 }
 0x709   :  { %v536_v54 = vpop.permute.xlu1 %535 }
 0x70a   :  { %1324 = vmatmul.msk.bf16.vlgmr.msra.gmra.mxu1 %vm122_vm5, %v536_v54 }
 0x70b   :  { %886 = vmatpush.bf16.msra.mxu1 %v1653_v1 }
 0x70f   :  { %887 = vmatpush.bf16.msra.mxu1 %v1665_v5 }
 0x77d   :  { %v485_v55 = vpop.f32.mrf.mxu0 }
 0x77e   :  { %v490_v56 = vrot.slane %v485_v55, 2 }
 0x780   :  { %v492_v57 = vadd.f32 %v490_v56, %v1678_v9 }
 0x782   :  { %1418 = vtanh.f32 %v492_v57  ;;  %v1323_v4 = vmul.f32 -1.442695, %v492_v57 }
 0x783   :  { %v562_v58 = vpop.f32.mrf.mxu2 }
 0x785   :  { %v487_v59 = vpop.f32.mrf.mxu0 }
 0x787   :  { %v549_v60 = vpop.f32.mrf.mxu1 }
 0x788   :  { %v1419_v61 = vpop.eup %1418  ;;  %v563_v62 = vadd.f32 %v562_v58, %v549_v60 }
 0x789   :  { %518 = vrot.lane.b32.xlu2 %v1419_v61, %s1586_s17  ;;  %v1817_v61 = vadd.f32 %v1675_v7, %v1728_v43 }
 0x78a   :  { %v566_v63 = vadd.f32 %v1734_v50, %v563_v62 }
 0x78b   :  { %v564_v0 = vpop.f32.mrf.mxu2 }
 0x78c   :  { %1420 = vtanh.f32 %v566_v63  ;;  %v1326_v12 = vmul.f32 -1.442695, %v566_v63 }
 0x78d   :  { %1422 = vpow2.f32 %v1323_v4 }
 0x78f   :  { %v551_v2 = vpop.f32.mrf.mxu1 }
 0x792   :  { %v1421_v3 = vpop.eup %1420 }
 0x793   :  { %589 = vrot.lane.b32.xlu0 %v1421_v3, %s1586_s17  ;;  %v1423_v6 = vpop.eup %1422 }
 0x794   :  { %v496_v9 = vadd.f32 1.0, %v1423_v6 }
 0x796   :  { %1424 = vrcp.f32 %v496_v9  ;;  %v508_v15 = vand.u32 2147483648, %v496_v9  ;;  %vm502_vm8 = vweird.f32 %v496_v9  ;;  %v506_v16 = vand.u32 2147483647, %v496_v9 }
 0x797   :  { %1426 = vpow2.f32 %v1326_v12 }
 0x798   :  { %v509_v18 = vor.u32 1.1754944e-38, %v508_v15  ;;  %vm507_vm10 = vcmp.eq.f32.partialorder %v506_v16, 8.507059e+37 }
 0x79c   :  { %v1425_v8 = vpop.eup %1424 }
 0x79d   :  { %v498_v10 = vmul.f32 %v1425_v8, %v496_v9  ;;  %vm503_vm7 = vweird.f32 %v1425_v8  ;;  %v1427_v19 = vpop.eup %1426 }
 0x79e   :  { %vm504_vm9 = vmor %vm502_vm8, %vm503_vm7  ;;  %v570_v23 = vadd.f32 1.0, %v1427_v19 }
 0x79f   :  { %v499_v11 = vsub.f32 1.0, %v498_v10 }
 0x7a0   :  { %1428 = vrcp.f32 %v570_v23  ;;  %v582_v30 = vand.u32 2147483648, %v570_v23  ;;  %vm576_vm12 = vweird.f32 %v570_v23  ;;  %v580_v32 = vand.u32 2147483647, %v570_v23 }
 0x7a1   :  { %v500_v13 = vmul.f32 %v1425_v8, %v499_v11 }
 0x7a2   :  { %v583_v39 = vor.u32 1.1754944e-38, %v582_v30  ;;  %vm581_vm14 = vcmp.eq.f32.partialorder %v580_v32, 8.507059e+37 }
 0x7a3   :  { %v501_v14 = vadd.f32 %v1425_v8, %v500_v13 }
 0x7a5   :  { %v505_v17 = vsel %vm504_vm9, %v1425_v8, %v501_v14 }
 0x7a6   :  { %v510_v20 = vsel %vm507_vm10, %v509_v18, %v505_v17  ;;  %v1429_v24 = vpop.eup %1428 }
 0x7a7   :  { %v572_v25 = vmul.f32 %v1429_v24, %v570_v23  ;;  %vm577_vm11 = vweird.f32 %v1429_v24  ;;  %v516_v46 = vmul.f32 %v514_v44, %v510_v20 }
 0x7a8   :  { %vm578_vm13 = vmor %vm576_vm12, %vm577_vm11 }
 0x7a9   :  { %v573_v26 = vsub.f32 1.0, %v572_v25 }
 0x7ab   :  { %v574_v27 = vmul.f32 %v1429_v24, %v573_v26 }
 0x7ad   :  { %v575_v29 = vadd.f32 %v1429_v24, %v574_v27 }
 0x7af   :  { %v579_v38 = vsel %vm578_vm13, %v1429_v24, %v575_v29 }
 0x7b0   :  { %v584_v41 = vsel %vm581_vm14, %v583_v39, %v579_v38 }
 0x7b1   :  { %v587_v49 = vmul.f32 %v584_v41, %v1773_v45 }
 0x7e3   :  { %v519_v21 = vpop.permute.xlu2 %518 }
 0x7e4   :  { %v521_v22 = vmul.f32 %v519_v21, %v510_v20 }
 0x7e6   :  { %523 = vrot.lane.b32.xlu1 %v521_v22, %s1590_s2 }
 0x805   :  { %v590_v31 = vpop.permute.xlu0 %589 }
 0x806   :  { %v592_v42 = vmul.f32 %v590_v31, %v584_v41 }
 0x808   :  { %594 = vrot.lane.b32.xlu2 %v592_v42, %s1590_s2 }
 0x858   :  { %v524_v28 = vpop.permute.xlu1 %523 }
 0x859   :  { %v1795_v47 = vadd.f32 %v524_v28, %v516_v46 }
 0x85b   :  { %1430 = vtanh.f32 %v1795_v47  ;;  %v647_v46 = vrot.slane %v1795_v47, 6 }
 0x861   :  { %v1431_v48 = vpop.eup %1430 }
 0x862   :  { %529 = vrot.lane.b32.xlu0 %v1431_v48, %s1586_s17  ;;  %v595_v51 = vpop.permute.xlu2 %594 }
 0x863   :  { %v1800_v52 = vadd.f32 %v595_v51, %v587_v49 }
 0x865   :  { %1432 = vtanh.f32 %v1800_v52 }
 0x86b   :  { %v1433_v53 = vpop.eup %1432 }
 0x86c   :  { %600 = vrot.lane.b32.xlu1 %v1433_v53, %s1586_s17 }
 0x8d4   :  { %v530_v40 = vpop.permute.xlu0 %529 }
 0x8d5   :  { %v532_v37 = vmul.f32 %v530_v40, %v510_v20 }
 0x8d7   :  { %v604_v54 = vpack.c.bf16 %v532_v37, %v532_v37 }
 0x8d9   :  { %v606_v55 = vrot.slane %v604_v54, 3 }
 0x8db   :  { %607 = vrot.lane.b32.xlu2 %v606_v55, %s1590_s2 }
 0x8de   :  { %v601_v56 = vpop.permute.xlu1 %600 }
 0x8df   :  { %v603_v57 = vmul.f32 %v601_v56, %v584_v41 }
 0x8e1   :  { %v666_v58 = vpack.c.bf16 %v603_v57, %v603_v57 }
 0x8e3   :  { %668 = vrot.lane.b32.xlu0 %v666_v58, %s1590_s2 }
 0x935   :  { %v608_v45 = vpop.permute.xlu2 %607 }
 0x936   :  { %1327 = vmatmul.msk.bf16.vlgmr.msra.gmra.mxu3 %vm122_vm5, %v608_v45  ;;  %1330 = vmatmul.msk.bf16.vlgmr.msrb.gmra.mxu1 %vm122_vm5, %v608_v45 }
 0x937   :  { %963 = vmatpush.bf16.msra.mxu3 %v1695_v34  ;;  %1086 = vmatpush.bf16.msrb.mxu1 %v1690_v33 }
 0x93b   :  { %964 = vmatpush.bf16.msra.mxu3 %v1707_v36  ;;  %1087 = vmatpush.bf16.msrb.mxu1 %v1701_v35 }
 0x955   :  { %v669_v59 = vpop.permute.xlu0 %668 }
 0x956   :  { %1329 = vmatmul.msk.bf16.vlgmr.msrb.gmra.mxu0 %vm122_vm5, %v669_v59 }
 0x957   :  { %1022 = vmatpush.bf16.msrb.mxu0 %v1653_v1 }
 0x95b   :  { %1023 = vmatpush.bf16.msrb.mxu0 %v1665_v5 }
 0x9b3   :  { %v695_v60 = vpop.f32.mrf.mxu1 }
 0x9b9   :  { %v621_v62 = vpop.f32.mrf.mxu3 }
 0x9ba   :  { %v625_v63 = vadd.f32 %v621_v62, %v1817_v61 }
 0x9bb   :  { %v697_v0 = vpop.f32.mrf.mxu1 }
 0x9bc   :  { %1434 = vtanh.f32 %v625_v63  ;;  %v1328_v7 = vmul.f32 -1.442695, %v625_v63 }
 0x9c1   :  { %v623_v2 = vpop.f32.mrf.mxu3 }
 0x9c2   :  { %v1435_v3 = vpop.eup %1434 }
 0x9c3   :  { %651 = vrot.lane.b32.xlu1 %v1435_v3, %s1586_s17 }
 0x9d3   :  { %v682_v4 = vpop.f32.mrf.mxu0 }
 0x9d4   :  { %v696_v6 = vadd.f32 %v695_v60, %v682_v4 }
 0x9d6   :  { %v699_v1 = vadd.f32 %v1734_v50, %v696_v6 }
 0x9d8   :  { %1436 = vtanh.f32 %v699_v1  ;;  %v1331_v43 = vmul.f32 -1.442695, %v699_v1 }
 0x9d9   :  { %1438 = vpow2.f32 %v1328_v7 }
 0x9da   :  { %1440 = vpow2.f32 %v1331_v43 }
 0x9db   :  { %v684_v5 = vpop.f32.mrf.mxu0 }
 0x9de   :  { %v1437_v9 = vpop.eup %1436 }
 0x9df   :  { %722 = vrot.lane.b32.xlu2 %v1437_v9, %s1586_s17  ;;  %v1439_v8 = vpop.eup %1438 }
 0x9e0   :  { %v629_v10 = vadd.f32 1.0, %v1439_v8  ;;  %v1441_v11 = vpop.eup %1440 }
 0x9e1   :  { %v703_v12 = vadd.f32 1.0, %v1441_v11 }
 0x9e2   :  { %1442 = vrcp.f32 %v629_v10  ;;  %v641_v22 = vand.u32 2147483648, %v629_v10  ;;  %vm635_vm0 = vweird.f32 %v629_v10  ;;  %v639_v23 = vand.u32 2147483647, %v629_v10 }
 0x9e3   :  { %1444 = vrcp.f32 %v703_v12  ;;  %v715_v27 = vand.u32 2147483648, %v703_v12  ;;  %vm709_vm4 = vweird.f32 %v703_v12  ;;  %v713_v29 = vand.u32 2147483647, %v703_v12 }
 0x9e4   :  { %v642_v26 = vor.u32 1.1754944e-38, %v641_v22  ;;  %vm640_vm3 = vcmp.eq.f32.partialorder %v639_v23, 8.507059e+37 }
 0x9e5   :  { %v716_v31 = vor.u32 1.1754944e-38, %v715_v27  ;;  %vm714_vm7 = vcmp.eq.f32.partialorder %v713_v29, 8.507059e+37 }
 0x9e8   :  { %v1443_v13 = vpop.eup %1442 }
 0x9e9   :  { %v631_v14 = vmul.f32 %v1443_v13, %v629_v10  ;;  %v1445_v15 = vpop.eup %1444  ;;  %vm636_vm15 = vweird.f32 %v1443_v13 }
 0x9ea   :  { %v705_v17 = vmul.f32 %v1445_v15, %v703_v12  ;;  %vm637_vm1 = vmor %vm635_vm0, %vm636_vm15  ;;  %vm710_vm2 = vweird.f32 %v1445_v15 }
 0x9eb   :  { %v632_v16 = vsub.f32 1.0, %v631_v14  ;;  %vm711_vm6 = vmor %vm709_vm4, %vm710_vm2 }
 0x9ec   :  { %v706_v19 = vsub.f32 1.0, %v705_v17 }
 0x9ed   :  { %v633_v18 = vmul.f32 %v1443_v13, %v632_v16 }
 0x9ee   :  { %v707_v21 = vmul.f32 %v1445_v15, %v706_v19 }
 0x9ef   :  { %v634_v20 = vadd.f32 %v1443_v13, %v633_v18 }
 0x9f0   :  { %v708_v25 = vadd.f32 %v1445_v15, %v707_v21 }
 0x9f1   :  { %v638_v24 = vsel %vm637_vm1, %v1443_v13, %v634_v20 }
 0x9f2   :  { %v643_v30 = vsel %vm640_vm3, %v642_v26, %v638_v24  ;;  %v712_v39 = vsel %vm711_vm6, %v1445_v15, %v708_v25 }
 0x9f3   :  { %v717_v42 = vsel %vm714_vm7, %v716_v31, %v712_v39  ;;  %v649_v28 = vmul.f32 %v647_v46, %v643_v30 }
 0x9f4   :  { %v720_v51 = vmul.f32 %v717_v42, %v1800_v52 }
 0xa35   :  { %v652_v32 = vpop.permute.xlu1 %651 }
 0xa36   :  { %v654_v38 = vmul.f32 %v652_v32, %v643_v30 }
 0xa38   :  { %656 = vrot.lane.b32.xlu0 %v654_v38, %s1590_s2 }
 0xa39   :  { %v723_v41 = vpop.permute.xlu2 %722 }
 0xa3a   :  { %v725_v44 = vmul.f32 %v723_v41, %v717_v42 }
 0xa3c   :  { %727 = vrot.lane.b32.xlu1 %v725_v44, %s1590_s2 }
 0xaaa   :  { %v657_v48 = vpop.permute.xlu0 %656 }
 0xaab   :  { %v1826_v49 = vadd.f32 %v657_v48, %v649_v28 }
 0xaad   :  { %1446 = vtanh.f32 %v1826_v49  ;;  %v782_v41 = vrot.slane %v1826_v49, 6 }
 0xaae   :  { %v728_v53 = vpop.permute.xlu1 %727 }
 0xaaf   :  { %v1830_v40 = vadd.f32 %v728_v53, %v720_v51 }
 0xab1   :  { %1448 = vtanh.f32 %v1830_v40 }
 0xab3   :  { %v1447_v37 = vpop.eup %1446 }
 0xab4   :  { %662 = vrot.lane.b32.xlu2 %v1447_v37, %s1586_s17 }
 0xab7   :  { %v1449_v54 = vpop.eup %1448 }
 0xab8   :  { %733 = vrot.lane.b32.xlu0 %v1449_v54, %s1586_s17 }
 0xb0e   :  { %v663_v47 = vpop.permute.xlu2 %662 }
 0xb0f   :  { %v665_v55 = vmul.f32 %v663_v47, %v643_v30 }
 0xb11   :  { %v737_v56 = vpack.c.bf16 %v665_v55, %v665_v55 }
 0xb13   :  { %739 = vrot.lane.b32.xlu1 %v737_v56, %s1590_s2 }
 0xb2a   :  { %v734_v57 = vpop.permute.xlu0 %733 }
 0xb2b   :  { %v736_v58 = vmul.f32 %v734_v57, %v717_v42 }
 0xb2d   :  { %v801_v45 = vpack.c.bf16 %v736_v58, %v736_v58 }
 0xb2f   :  { %803 = vrot.lane.b32.xlu2 %v801_v45, %s1590_s2 }
 0xb85   :  { %v740_v52 = vpop.permute.xlu1 %739 }
 0xb86   :  { %1332 = vmatmul.msk.bf16.vlgmr.msrb.gmra.mxu2 %vm122_vm5, %v740_v52  ;;  %1335 = vmatmul.msk.bf16.vlgmr.msra.gmra.mxu0 %vm122_vm5, %v740_v52 }
 0xb87   :  { %1099 = vmatpush.bf16.msrb.mxu2 %v1695_v34  ;;  %1178 = vmatpush.bf16.msra.mxu0 %v1695_v34 }
 0xb89   :  { %v804_v59 = vpop.permute.xlu2 %803 }
 0xb8a   :  { %1334 = vmatmul.msk.bf16.vlgmr.msrb.gmra.mxu3 %vm122_vm5, %v804_v59 }
 0xb8b   :  { %1100 = vmatpush.bf16.msrb.mxu2 %v1707_v36  ;;  %1179 = vmatpush.bf16.msra.mxu0 %v1707_v36 }
 0xb8c   :  { %1158 = vmatpush.bf16.msrb.mxu3 %v1690_v33 }
 0xb90   :  { %1159 = vmatpush.bf16.msrb.mxu3 %v1701_v35 }
 0xc03   :  { %v830_v60 = vpop.f32.mrf.mxu0 }
 0xc09   :  { %v753_v62 = vpop.f32.mrf.mxu2 }
 0xc0a   :  { %v758_v63 = vrot.slane %v753_v62, 6 }
 0xc0b   :  { %v832_v0 = vpop.f32.mrf.mxu0 }
 0xc0c   :  { %v760_v2 = vadd.f32 %v758_v63, %v1817_v61 }
 0xc0d   :  { %v817_v3 = vpop.f32.mrf.mxu3 }
 0xc0e   :  { %1450 = vtanh.f32 %v760_v2  ;;  %v831_v34 = vadd.f32 %v830_v60, %v817_v3  ;;  %v1333_v35 = vmul.f32 -1.442695, %v760_v2 }
 0xc10   :  { %v834_v4 = vadd.f32 %v1734_v50, %v831_v34 }
 0xc11   :  { %v755_v6 = vpop.f32.mrf.mxu2 }
 0xc12   :  { %1452 = vtanh.f32 %v834_v4  ;;  %v1336_v36 = vmul.f32 -1.442695, %v834_v4 }
 0xc13   :  { %1454 = vpow2.f32 %v1333_v35 }
 0xc14   :  { %v1451_v1 = vpop.eup %1450  ;;  %1456 = vpow2.f32 %v1336_v36 }
 0xc15   :  { %v819_v5 = vpop.f32.mrf.mxu3  ;;  %786 = vrot.lane.b32.xlu0 %v1451_v1, %s1586_s17 }
 0xc18   :  { %v1453_v33 = vpop.eup %1452 }
 0xc19   :  { %857 = vrot.lane.b32.xlu1 %v1453_v33, %s1586_s17  ;;  %v1455_v9 = vpop.eup %1454 }
 0xc1a   :  { %v764_v7 = vadd.f32 1.0, %v1455_v9  ;;  %v1457_v43 = vpop.eup %1456 }
 0xc1b   :  { %v838_v8 = vadd.f32 1.0, %v1457_v43 }
 0xc1c   :  { %1458 = vrcp.f32 %v764_v7  ;;  %v776_v19 = vand.u32 2147483648, %v764_v7  ;;  %vm770_vm9 = vweird.f32 %v764_v7  ;;  %v774_v20 = vand.u32 2147483647, %v764_v7 }
 0xc1d   :  { %1460 = vrcp.f32 %v838_v8  ;;  %v850_v24 = vand.u32 2147483648, %v838_v8  ;;  %vm844_vm13 = vweird.f32 %v838_v8  ;;  %v848_v25 = vand.u32 2147483647, %v838_v8 }
 0xc1e   :  { %v777_v23 = vor.u32 1.1754944e-38, %v776_v19  ;;  %vm775_vm12 = vcmp.eq.f32.partialorder %v774_v20, 8.507059e+37 }
 0xc1f   :  { %v851_v32 = vor.u32 1.1754944e-38, %v850_v24  ;;  %vm849_vm15 = vcmp.eq.f32.partialorder %v848_v25, 8.507059e+37 }
 0xc22   :  { %v1459_v10 = vpop.eup %1458 }
 0xc23   :  { %v766_v11 = vmul.f32 %v1459_v10, %v764_v7  ;;  %v1461_v12 = vpop.eup %1460  ;;  %vm771_vm8 = vweird.f32 %v1459_v10 }
 0xc24   :  { %v840_v14 = vmul.f32 %v1461_v12, %v838_v8  ;;  %vm772_vm10 = vmor %vm770_vm9, %vm771_vm8  ;;  %vm845_vm11 = vweird.f32 %v1461_v12 }
 0xc25   :  { %v767_v13 = vsub.f32 1.0, %v766_v11  ;;  %vm846_vm14 = vmor %vm844_vm13, %vm845_vm11 }
 0xc26   :  { %v841_v16 = vsub.f32 1.0, %v840_v14 }
 0xc27   :  { %v768_v15 = vmul.f32 %v1459_v10, %v767_v13 }
 0xc28   :  { %v842_v18 = vmul.f32 %v1461_v12, %v841_v16 }
 0xc29   :  { %v769_v17 = vadd.f32 %v1459_v10, %v768_v15 }
 0xc2a   :  { %v843_v22 = vadd.f32 %v1461_v12, %v842_v18 }
 0xc2b   :  { %v773_v21 = vsel %vm772_vm10, %v1459_v10, %v769_v17 }
 0xc2c   :  { %v778_v27 = vsel %vm775_vm12, %v777_v23, %v773_v21  ;;  %v847_v30 = vsel %vm846_vm14, %v1461_v12, %v843_v22 }
 0xc2d   :  { %v852_v39 = vsel %vm849_vm15, %v851_v32, %v847_v30  ;;  %v784_v42 = vmul.f32 %v782_v41, %v778_v27 }
 0xc2e   :  { %v855_v48 = vmul.f32 %v852_v39, %v1830_v40 }
 0xc87   :  { %v787_v26 = vpop.permute.xlu0 %786 }
 0xc88   :  { %v789_v29 = vmul.f32 %v787_v26, %v778_v27 }
 0xc8a   :  { %791 = vrot.lane.b32.xlu2 %v789_v29, %s1590_s2 }
 0xc8b   :  { %v858_v38 = vpop.permute.xlu1 %857 }
 0xc8c   :  { %v860_v31 = vmul.f32 %v858_v38, %v852_v39 }
 0xc8e   :  { %862 = vrot.lane.b32.xlu0 %v860_v31, %s1590_s2 }
 0xce4   :  { %v792_v44 = vpop.permute.xlu2 %791 }
 0xce5   :  { %v1853_v46 = vadd.f32 %v792_v44, %v784_v42 }
 0xce7   :  { %1462 = vtanh.f32 %v1853_v46  ;;  %v918_v38 = vrot.slane %v1853_v46, 6 }
 0xced   :  { %v1463_v28 = vpop.eup %1462 }
 0xcee   :  { %797 = vrot.lane.b32.xlu1 %v1463_v28, %s1586_s17 }
 0xd00   :  { %v863_v51 = vpop.permute.xlu0 %862 }
 0xd01   :  { %v1858_v53 = vadd.f32 %v863_v51, %v855_v48 }
 0xd03   :  { %1464 = vtanh.f32 %v1858_v53 }
 0xd09   :  { %v1465_v37 = vpop.eup %1464 }
 0xd0a   :  { %868 = vrot.lane.b32.xlu2 %v1465_v37, %s1586_s17 }
 0xd60   :  { %v798_v49 = vpop.permute.xlu1 %797 }
 0xd61   :  { %v800_v54 = vmul.f32 %v798_v49, %v778_v27 }
 0xd63   :  { %v872_v47 = vpack.c.bf16 %v800_v54, %v800_v54 }
 0xd64   :  { %v869_v55 = vpop.permute.xlu2 %868 }
 0xd65   :  { %v874_v56 = vrot.slane %v872_v47, 1  ;;  %v871_v57 = vmul.f32 %v869_v55, %v852_v39 }
 0xd67   :  { %v937_v58 = vpack.c.bf16 %v871_v57, %v871_v57  ;;  %875 = vrot.lane.b32.xlu0 %v874_v56, %s1590_s2 }
 0xd69   :  { %939 = vrot.lane.b32.xlu1 %v937_v58, %s1590_s2 }
 0xdd9   :  { %v876_v40 = vpop.permute.xlu0 %875 }
 0xdda   :  { %1337 = vmatmul.msk.bf16.vlgmr.msra.gmra.mxu1 %vm122_vm5, %v876_v40  ;;  %1340 = vmatmul.msk.bf16.vlgmr.msra.gmra.mxu3 %vm122_vm5, %v876_v40 }
 0xddb   :  { %v940_v45 = vpop.permute.xlu1 %939 }
 0xddc   :  { %1339 = vmatmul.msk.bf16.vlgmr.msra.gmra.mxu2 %vm122_vm5, %v940_v45 }
 0xe57   :  { %v889_v52 = vpop.f32.mrf.mxu1 }
 0xe58   :  { %v894_v59 = vrot.slane %v889_v52, 4 }
 0xe5a   :  { %v896_v60 = vadd.f32 %v894_v59, %v1817_v61 }
 0xe5c   :  { %1466 = vtanh.f32 %v896_v60  ;;  %v1338_v5 = vmul.f32 -1.442695, %v896_v60 }
 0xe5d   :  { %v966_v62 = vpop.f32.mrf.mxu3 }
 0xe5f   :  { %v891_v63 = vpop.f32.mrf.mxu1  ;;  %v953_v0 = vpop.f32.mrf.mxu2 }
 0xe60   :  { %v967_v2 = vadd.f32 %v966_v62, %v953_v0 }
 0xe62   :  { %v1467_v3 = vpop.eup %1466  ;;  %v970_v34 = vadd.f32 %v1734_v50, %v967_v2  ;;  %v1893_v2 = vld [vmem:[%s1928_s6] ss:$0 sm:$0xff] }
 0xe63   :  { %922 = vrot.lane.b32.xlu2 %v1467_v3, %s1586_s17 }
 0xe64   :  { %1468 = vtanh.f32 %v970_v34  ;;  %v1341_v43 = vmul.f32 -1.442695, %v970_v34 }
 0xe65   :  { %v968_v4 = vpop.f32.mrf.mxu3  ;;  %1470 = vpow2.f32 %v1338_v5 }
 0xe67   :  { %v955_v6 = vpop.f32.mrf.mxu2 }
 0xe6a   :  { %v1469_v1 = vpop.eup %1468 }
 0xe6b   :  { %993 = vrot.lane.b32.xlu0 %v1469_v1, %s1586_s17  ;;  %v1471_v33 = vpop.eup %1470 }
 0xe6c   :  { %v900_v35 = vadd.f32 1.0, %v1471_v33 }
 0xe6e   :  { %1472 = vrcp.f32 %v900_v35  ;;  %v912_v10 = vand.u32 2147483648, %v900_v35  ;;  %vm906_vm1 = vweird.f32 %v900_v35  ;;  %v910_v11 = vand.u32 2147483647, %v900_v35 }
 0xe6f   :  { %1474 = vpow2.f32 %v1341_v43 }
 0xe70   :  { %v913_v14 = vor.u32 1.1754944e-38, %v912_v10  ;;  %vm911_vm3 = vcmp.eq.f32.partialorder %v910_v11, 8.507059e+37 }
 0xe74   :  { %v1473_v36 = vpop.eup %1472 }
 0xe75   :  { %v902_v9 = vmul.f32 %v1473_v36, %v900_v35  ;;  %vm907_vm0 = vweird.f32 %v1473_v36  ;;  %v1475_v12 = vpop.eup %1474 }
 0xe76   :  { %vm908_vm2 = vmor %vm906_vm1, %vm907_vm0  ;;  %v974_v15 = vadd.f32 1.0, %v1475_v12 }
 0xe77   :  { %v903_v7 = vsub.f32 1.0, %v902_v9 }
 0xe78   :  { %1476 = vrcp.f32 %v974_v15  ;;  %v986_v24 = vand.u32 2147483648, %v974_v15  ;;  %vm980_vm6 = vweird.f32 %v974_v15  ;;  %v984_v25 = vand.u32 2147483647, %v974_v15 }
 0xe79   :  { %v904_v8 = vmul.f32 %v1473_v36, %v903_v7 }
 0xe7a   :  { %v987_v27 = vor.u32 1.1754944e-38, %v986_v24  ;;  %vm985_vm8 = vcmp.eq.f32.partialorder %v984_v25, 8.507059e+37 }
 0xe7b   :  { %v905_v50 = vadd.f32 %v1473_v36, %v904_v8 }
 0xe7d   :  { %v909_v13 = vsel %vm908_vm2, %v1473_v36, %v905_v50 }
 0xe7e   :  { %v914_v17 = vsel %vm911_vm3, %v913_v14, %v909_v13  ;;  %v1477_v19 = vpop.eup %1476 }
 0xe7f   :  { %v976_v20 = vmul.f32 %v1477_v19, %v974_v15  ;;  %vm981_vm4 = vweird.f32 %v1477_v19  ;;  %v920_v39 = vmul.f32 %v918_v38, %v914_v17 }
 0xe80   :  { %vm982_vm7 = vmor %vm980_vm6, %vm981_vm4  ;;  %vm1263_vm6 = vcmask 25600  }
 0xe81   :  { %v977_v21 = vsub.f32 1.0, %v976_v20 }
 0xe83   :  { %v978_v22 = vmul.f32 %v1477_v19, %v977_v21 }
 0xe85   :  { %v979_v23 = vadd.f32 %v1477_v19, %v978_v22 }
 0xe87   :  { %v983_v26 = vsel %vm982_vm7, %v1477_v19, %v979_v23 }
 0xe88   :  { %v988_v30 = vsel %vm985_vm8, %v987_v27, %v983_v26 }
 0xe89   :  { %v991_v42 = vmul.f32 %v988_v30, %v1858_v53 }
 0xebd   :  { %v923_v16 = vpop.permute.xlu2 %922 }
 0xebe   :  { %v925_v18 = vmul.f32 %v923_v16, %v914_v17 }
 0xec0   :  { %927 = vrot.lane.b32.xlu1 %v925_v18, %s1590_s2 }
 0xedd   :  { %v994_v29 = vpop.permute.xlu0 %993 }
 0xede   :  { %v996_v32 = vmul.f32 %v994_v29, %v988_v30 }
 0xee0   :  { %998 = vrot.lane.b32.xlu2 %v996_v32, %s1590_s2 }
 0xf32   :  { %v928_v31 = vpop.permute.xlu1 %927 }
 0xf33   :  { %v1874_v41 = vadd.f32 %v928_v31, %v920_v39 }
 0xf35   :  { %1478 = vtanh.f32 %v1874_v41  ;;  %v1054_v29 = vrot.slane %v1874_v41, 6 }
 0xf3a   :  { %v999_v44 = vpop.permute.xlu2 %998 }
 0xf3b   :  { %v1479_v28 = vpop.eup %1478  ;;  %v1878_v48 = vadd.f32 %v999_v44, %v991_v42 }
 0xf3c   :  { %933 = vrot.lane.b32.xlu0 %v1479_v28, %s1586_s17 }
 0xf3d   :  { %1480 = vtanh.f32 %v1878_v48 }
 0xf43   :  { %v1481_v51 = vpop.eup %1480 }
 0xf44   :  { %1004 = vrot.lane.b32.xlu1 %v1481_v51, %s1586_s17 }
 0xfae   :  { %v934_v46 = vpop.permute.xlu0 %933 }
 0xfaf   :  { %v936_v37 = vmul.f32 %v934_v46, %v914_v17 }
 0xfb1   :  { %v1008_v49 = vpack.c.bf16 %v936_v37, %v936_v37 }
 0xfb3   :  { %v1010_v54 = vrot.slane %v1008_v49, 2 }
 0xfb5   :  { %1011 = vrot.lane.b32.xlu2 %v1010_v54, %s1590_s2 }
 0xfb6   :  { %v1005_v47 = vpop.permute.xlu1 %1004 }
 0xfb7   :  { %v1007_v55 = vmul.f32 %v1005_v47, %v988_v30 }
 0xfb9   :  { %v1073_v53 = vpack.c.bf16 %v1007_v55, %v1007_v55 }
 0xfbb   :  { %1075 = vrot.lane.b32.xlu0 %v1073_v53, %s1590_s2 }
0x100f   :  { %v1012_v56 = vpop.permute.xlu2 %1011 }
0x1010   :  { %1342 = vmatmul.msk.bf16.vlgmr.msrb.gmra.mxu0 %vm122_vm5, %v1012_v56  ;;  %1345 = vmatmul.msk.bf16.vlgmr.msrb.gmra.mxu2 %vm122_vm5, %v1012_v56 }
0x102d   :  { %v1076_v57 = vpop.permute.xlu0 %1075 }
0x102e   :  { %1344 = vmatmul.msk.bf16.vlgmr.msrb.gmra.mxu1 %vm122_vm5, %v1076_v57 }
0x108d   :  { %v1025_v58 = vpop.f32.mrf.mxu0 }
0x108e   :  { %v1030_v40 = vrot.slane %v1025_v58, 2 }
0x1090   :  { %v1032_v45 = vadd.f32 %v1030_v40, %v1817_v61 }
0x1092   :  { %1482 = vtanh.f32 %v1032_v45  ;;  %v1343_v61 = vmul.f32 -1.442695, %v1032_v45 }
0x1093   :  { %v1102_v52 = vpop.f32.mrf.mxu2 }
0x1095   :  { %v1027_v59 = vpop.f32.mrf.mxu0 }
0x1098   :  { %v1483_v60 = vpop.eup %1482 }
0x1099   :  { %1058 = vrot.lane.b32.xlu2 %v1483_v60, %s1586_s17 }
0x109b   :  { %v1104_v62 = vpop.f32.mrf.mxu2 }
0x10ab   :  { %v1089_v63 = vpop.f32.mrf.mxu1 }
0x10ac   :  { %v1103_v0 = vadd.f32 %v1102_v52, %v1089_v63 }
0x10ae   :  { %v1106_v3 = vadd.f32 %v1893_v2, %v1103_v0 }
0x10b0   :  { %1484 = vtanh.f32 %v1106_v3  ;;  %v1346_v13 = vmul.f32 -1.442695, %v1106_v3 }
0x10b1   :  { %1486 = vpow2.f32 %v1343_v61 }
0x10b3   :  { %v1091_v34 = vpop.f32.mrf.mxu1 }
0x10b6   :  { %v1485_v4 = vpop.eup %1484 }
0x10b7   :  { %1129 = vrot.lane.b32.xlu1 %v1485_v4, %s1586_s17  ;;  %v1487_v6 = vpop.eup %1486 }
0x10b8   :  { %v1036_v1 = vadd.f32 1.0, %v1487_v6 }
0x10ba   :  { %1488 = vrcp.f32 %v1036_v1  ;;  %v1048_v7 = vand.u32 2147483648, %v1036_v1  ;;  %vm1042_vm10 = vweird.f32 %v1036_v1  ;;  %v1046_v43 = vand.u32 2147483647, %v1036_v1 }
0x10bb   :  { %1490 = vpow2.f32 %v1346_v13 }
0x10bc   :  { %v1049_v50 = vor.u32 1.1754944e-38, %v1048_v7  ;;  %vm1047_vm12 = vcmp.eq.f32.partialorder %v1046_v43, 8.507059e+37 }
0x10c0   :  { %v1489_v5 = vpop.eup %1488 }
0x10c1   :  { %v1038_v33 = vmul.f32 %v1489_v5, %v1036_v1  ;;  %vm1043_vm9 = vweird.f32 %v1489_v5  ;;  %v1491_v14 = vpop.eup %1490 }
0x10c2   :  { %vm1044_vm11 = vmor %vm1042_vm10, %vm1043_vm9  ;;  %v1110_v15 = vadd.f32 1.0, %v1491_v14  ;;  %v1377_v14 = vld [vmem:[#allocation5] ss:$0 sm:$0xff] }
0x10c3   :  { %v1039_v35 = vsub.f32 1.0, %v1038_v33 }
0x10c4   :  { %1492 = vrcp.f32 %v1110_v15  ;;  %v1122_v21 = vand.u32 2147483648, %v1110_v15  ;;  %vm1116_vm14 = vweird.f32 %v1110_v15  ;;  %v1120_v22 = vand.u32 2147483647, %v1110_v15 }
0x10c5   :  { %v1040_v36 = vmul.f32 %v1489_v5, %v1039_v35 }
0x10c6   :  { %v1123_v24 = vor.u32 1.1754944e-38, %v1122_v21  ;;  %vm1121_vm0 = vcmp.eq.f32.partialorder %v1120_v22, 8.507059e+37 }
0x10c7   :  { %v1041_v9 = vadd.f32 %v1489_v5, %v1040_v36 }
0x10c9   :  { %v1045_v8 = vsel %vm1044_vm11, %v1489_v5, %v1041_v9 }
0x10ca   :  { %v1050_v11 = vsel %vm1047_vm12, %v1049_v50, %v1045_v8  ;;  %v1493_v16 = vpop.eup %1492  ;;  %v1367_v8 = vld [vmem:[%s1929_s7 + $0x8] sm:$0xff]  ;;  %v1366_v50 = vld [vmem:[%s1929_s7] sm:$0xff] }
0x10cb   :  { %v1112_v17 = vmul.f32 %v1493_v16, %v1110_v15  ;;  %vm1117_vm13 = vweird.f32 %v1493_v16  ;;  %v1056_v30 = vmul.f32 %v1054_v29, %v1050_v11  ;;  %1256 = vmatpush.bf16.msra.mxu1 %v1367_v8 }
0x10cc   :  { %vm1118_vm15 = vmor %vm1116_vm14, %vm1117_vm13 }
0x10cd   :  { %v1113_v18 = vsub.f32 1.0, %v1112_v17 }
0x10cf   :  { %v1114_v19 = vmul.f32 %v1493_v16, %v1113_v18  ;;  %1257 = vmatpush.bf16.msra.mxu1 %v1366_v50 }
0x10d1   :  { %v1115_v20 = vadd.f32 %v1493_v16, %v1114_v19 }
0x10d3   :  { %v1119_v23 = vsel %vm1118_vm15, %v1493_v16, %v1115_v20 }
0x10d4   :  { %v1124_v26 = vsel %vm1121_vm0, %v1123_v24, %v1119_v23 }
0x10d5   :  { %v1127_v31 = vmul.f32 %v1124_v26, %v1878_v48 }
0x10f3   :  { %v1059_v10 = vpop.permute.xlu2 %1058 }
0x10f4   :  { %v1061_v12 = vmul.f32 %v1059_v10, %v1050_v11 }
0x10f6   :  { %1063 = vrot.lane.b32.xlu1 %v1061_v12, %s1590_s2 }
0x1129   :  { %v1130_v25 = vpop.permute.xlu1 %1129 }
0x112a   :  { %v1132_v27 = vmul.f32 %v1130_v25, %v1124_v26 }
0x112c   :  { %1134 = vrot.lane.b32.xlu0 %v1132_v27, %s1590_s2 }
0x1168   :  { %v1064_v32 = vpop.permute.xlu1 %1063 }
0x1169   :  { %v1066_v38 = vadd.f32 %v1064_v32, %v1056_v30 }
0x116b   :  { %1494 = vtanh.f32 %v1066_v38 }
0x1171   :  { %v1495_v39 = vpop.eup %1494 }
0x1172   :  { %1069 = vrot.lane.b32.xlu0 %v1495_v39, %s1586_s17 }
0x119e   :  { %v1135_v42 = vpop.permute.xlu0 %1134 }
0x119f   :  { %v1137_v44 = vadd.f32 %v1135_v42, %v1127_v31 }
0x11a1   :  { %1496 = vtanh.f32 %v1137_v44 }
0x11a7   :  { %v1497_v28 = vpop.eup %1496 }
0x11a8   :  { %1140 = vrot.lane.b32.xlu2 %v1497_v28, %s1586_s17 }
0x11e4   :  { %v1070_v51 = vpop.permute.xlu0 %1069 }
0x11e5   :  { %v1072_v46 = vmul.f32 %v1070_v51, %v1050_v11 }
0x11e7   :  { %v1144_v37 = vpack.c.bf16 %v1072_v46, %v1072_v46 }
0x11e9   :  { %v1166_v49 = vrot.slane %v1144_v37, 3 }
0x11eb   :  { %1167 = vrot.lane.b32.xlu2 %v1166_v49, %s1590_s2 }
0x1202   :  { %v1141_v41 = vpop.permute.xlu2 %1140 }
0x1203   :  { %v1143_v54 = vmul.f32 %v1141_v41, %v1124_v26 }
0x1205   :  { %v1145_v47 = vpack.c.bf16 %v1143_v54, %v1143_v54 }
0x1207   :  { %1147 = vrot.lane.b32.xlu1 %v1145_v47, %s1590_s2 }
0x1245   :  { %v1168_v55 = vpop.permute.xlu2 %1167 }
0x1246   :  { %1348 = vmatmul.msk.bf16.vlgmr.msra.gmra.mxu0 %vm122_vm5, %v1168_v55 }
0x1279   :  { %v1148_v48 = vpop.permute.xlu1 %1147 }
0x127a   :  { %1347 = vmatmul.msk.bf16.vlgmr.msrb.gmra.mxu3 %vm122_vm5, %v1148_v48 }
0x12c3   :  { %v1181_v53 = vpop.f32.mrf.mxu0 }
0x12cb   :  { %v1183_v56 = vpop.f32.mrf.mxu0 }
0x12fd   :  { %v1161_v57 = vpop.f32.mrf.mxu3 }
0x12fe   :  { %v1182_v58 = vadd.f32 %v1181_v53, %v1161_v57 }
0x1300   :  { %v1185_v40 = vadd.f32 %v1893_v2, %v1182_v58 }
0x1302   :  { %1498 = vtanh.f32 %v1185_v40  ;;  %v1349_v59 = vmul.f32 -1.442695, %v1185_v40 }
0x1304   :  { %1500 = vpow2.f32 %v1349_v59 }
0x1305   :  { %v1163_v45 = vpop.f32.mrf.mxu3 }
0x1308   :  { %v1499_v52 = vpop.eup %1498 }
0x1309   :  { %1208 = vrot.lane.b32.xlu0 %v1499_v52, %s1586_s17 }
0x130a   :  { %v1501_v60 = vpop.eup %1500 }
0x130b   :  { %v1189_v62 = vadd.f32 1.0, %v1501_v60 }
0x130d   :  { %1502 = vrcp.f32 %v1189_v62  ;;  %v1201_v61 = vand.u32 2147483648, %v1189_v62  ;;  %vm1195_vm2 = vweird.f32 %v1189_v62  ;;  %v1199_v6 = vand.u32 2147483647, %v1189_v62 }
0x130f   :  { %v1202_v1 = vor.u32 1.1754944e-38, %v1201_v61  ;;  %vm1200_vm4 = vcmp.eq.f32.partialorder %v1199_v6, 8.507059e+37 }
0x1313   :  { %v1503_v63 = vpop.eup %1502 }
0x1314   :  { %v1191_v0 = vmul.f32 %v1503_v63, %v1189_v62  ;;  %vm1196_vm1 = vweird.f32 %v1503_v63 }
0x1315   :  { %vm1197_vm3 = vmor %vm1195_vm2, %vm1196_vm1 }
0x1316   :  { %v1192_v3 = vsub.f32 1.0, %v1191_v0 }
0x1318   :  { %v1193_v34 = vmul.f32 %v1503_v63, %v1192_v3 }
0x131a   :  { %v1194_v4 = vadd.f32 %v1503_v63, %v1193_v34 }
0x131c   :  { %v1198_v2 = vsel %vm1197_vm3, %v1503_v63, %v1194_v4 }
0x131d   :  { %v1203_v33 = vsel %vm1200_vm4, %v1202_v1, %v1198_v2 }
0x131e   :  { %v1206_v36 = vmul.f32 %v1203_v33, %v1137_v44 }
0x137b   :  { %v1209_v5 = vpop.permute.xlu0 %1208 }
0x137c   :  { %v1211_v35 = vmul.f32 %v1209_v5, %v1203_v33 }
0x137e   :  { %1213 = vrot.lane.b32.xlu1 %v1211_v35, %s1590_s2 }
0x13f0   :  { %v1214_v9 = vpop.permute.xlu1 %1213 }
0x13f1   :  { %v1216_v7 = vadd.f32 %v1214_v9, %v1206_v36 }
0x13f3   :  { %1504 = vtanh.f32 %v1216_v7 }
0x13f9   :  { %v1505_v43 = vpop.eup %1504 }
0x13fa   :  { %1219 = vrot.lane.b32.xlu2 %v1505_v43, %s1586_s17  ;;  %s1591_s17 = smov [#allocation7]  }
0x13fb   :  { %s1270_s20 = sshll.u32 %s1591_s17, 4  ;;  %s1271_s20 = int_to_ptr.vmem [resolvable:$true] %s1270_s20 }
0x1454   :  { %v1220_v10 = vpop.permute.xlu2 %1219 }
0x1455   :  { %v1222_v11 = vmul.f32 %v1220_v10, %v1203_v33 }
0x1457   :  { %v1223_v12 = vpack.c.bf16 %v1222_v11, %v1222_v11 }
0x1459   :  { %1233 = vrot.lane.b32.xlu0 %v1223_v12, %s1590_s2 }
0x14cb   :  { %v1234_v13 = vpop.permute.xlu0 %1233 }
0x14cc   :  { %1358 = vmatmul.msk.bf16.vlgmr.msra.gmra.mxu1 %vm122_vm5, %v1234_v13 }
0x1549   :  { %v1259_v15 = vpop.f32.mrf.mxu1 }
0x154a   :  { %v1260_v16 = vadd.f32 %v1377_v14, %v1259_v15 }
0x154c   :  { %1264 = vst.msk [vmem:[#allocation7] sm:$0x3] %vm1263_vm6, %v1260_v16 }
0x154d   :  { %1275 = dma.vmem_to_hbm [thread:$0]  %s1271_s20, 32, %s1273_s8, [#allocation4]  }
0x1551   :  { %v1261_v17 = vpop.f32.mrf.mxu1 }
0x1552   :  { %1583 = dma.done.wait [#allocation4], 32  }
0x1553   :  { %1584 = vsyncadd [#allocation4], 4294967264 }
0x1554   :  { %1280 = vsyncpa [#allocation3], 1 }
0x1555   :  { %1281 = vsyncpa [#allocation6], 1 }
0x1556   :  { %1282 = vsyncpa [#allocation4], 1 }

</bundles_post_ra>
